<compile_context>
chip_gen: v7x
topology: tpu7x:2x2x1
jax: 0.10.0
libtpu: 0.0.40
codegen_flags: <defaults>
</compile_context>

<pallas_src>
import functools

import jax
import jax.numpy as jnp
from jax.experimental import pallas as pl
from jax.experimental.pallas import tpu as pltpu

LANE = 128
SUBLANE = 8


# ---------------------------------------------------------------------------
# Small helpers
# ---------------------------------------------------------------------------
def _round_up(n, m):
    return ((n + m - 1) // m) * m


def _pad_to(x, shape):
    return jnp.pad(x, [(0, t - s) for s, t in zip(x.shape, shape)])


def _prelu(x, a):
    return jnp.where(x >= 0, x, a * x)


# ---------------------------------------------------------------------------
# Fully-fused TCN kernel (all TemporalBlocks + Linear head in one launch)
# ---------------------------------------------------------------------------
def _tcn_kernel(x_ref, *refs, num_blocks, ksize, has_ds, seq_len, pad_rows):
    # refs layout: per block [w1, b1, w2, b2, alphas, (wd, bd if downsample)],
    # then wh, bh (head), then head_out_ref, then pbuf (VMEM scratch).
    pos = 0
    blocks = []
    for bi in range(num_blocks):
        w1, b1, w2, b2, al = refs[pos:pos + 5]
        pos += 5
        if has_ds[bi]:
            wd, bd = refs[pos:pos + 2]
            pos += 2
        else:
            wd = bd = None
        blocks.append((w1, b1, w2, b2, al, wd, bd))
    wh_ref, bh_ref = refs[pos:pos + 2]
    pos += 2
    head_ref = refs[pos]
    pbuf = refs[pos + 1]

    L = seq_len
    c_pad = pbuf.shape[1]

    # Zero the causal left-pad region of the scratch once per grid step.  It is
    # never written afterwards, so every tap slice that reaches into it reads
    # zeros (== Conv1d left zero padding followed by Chomp1d).
    pbuf[0:pad_rows, :] = jnp.zeros((pad_rows, c_pad), jnp.float32)

    def causal_conv(x, w_ref, b_ref, dilation):
        # Write the activation ONCE at a sublane-aligned offset, then read the k
        # statically-offset shifted views, stack them along lanes (im2col) and do
        # a single (L, k*C_pad) @ (k*C_pad, C_pad) MXU matmul with f32 accumulate.
        pbuf[pad_rows:pad_rows + L, :] = x
        views = []
        for j in range(ksize):
            shift = (ksize - 1 - j) * dilation          # tap j multiplies x[t - shift]
            start = pad_rows - shift                    # static Python int
            views.append(pbuf[start:start + L, :])
        lhs = views[0] if ksize == 1 else jnp.concatenate(views, axis=-1)
        return jnp.dot(lhs, w_ref[...], preferred_element_type=jnp.float32) + b_ref[...]

    x = x_ref[0]                                         # (L, C_pad) f32
    for bi, (w1, b1, w2, b2, al, wd, bd) in enumerate(blocks):
        dilation = 2 ** bi
        alphas = al[...]                                 # (3, C_pad) f32
        a1, a2, a3 = alphas[0:1], alphas[1:2], alphas[2:3]
        # conv1 -> chomp -> PReLU (dropout == identity)
        h1 = _prelu(causal_conv(x, w1, b1, dilation), a1)
        # conv2 -> chomp -> PReLU
        h2 = _prelu(causal_conv(h1, w2, b2, dilation), a2)
        # residual path: identity or fused 1x1 downsample conv
        if wd is not None:
            res = jnp.dot(x, wd[...], preferred_element_type=jnp.float32) + bd[...]
        else:
            res = x
        x = _prelu(h2 + res, a3)                         # (L, C_pad) f32

    # forecast = Linear(y[:, :, -1]) -- consume the last timestep directly, in f32.
    y_last = x[L - 1:L, :]                               # (1, C_pad)
    head_ref[0] = (jnp.dot(y_last, wh_ref[...], preferred_element_type=jnp.float32)
                   + bh_ref[...])


def tcn_forward(inputs_ncl, params):
    """inputs_ncl: (N, C_in, L) -> forecast: (N, output_size)."""
    c_pad = params["c_pad"]
    output_size = params["output_size"]
    ksize = params["kernel_size"]
    blocks = params["blocks"]
    num_blocks = len(blocks)
    has_ds = tuple(blk["wd"] is not None for blk in blocks)

    x = jnp.transpose(inputs_ncl, (0, 2, 1)).astype(jnp.float32)   # NCL -> NLC (once)
    x = _pad_to(x, (x.shape[0], x.shape[1], c_pad))                 # lane-dense channels
    N, L, _ = x.shape

    max_shift = (ksize - 1) * (2 ** (num_blocks - 1))
    pad_rows = _round_up(max(max_shift, 1), SUBLANE)                # aligned left-pad region
    out_pad = params["wh"].shape[1]

    operands = [x]
    in_specs = [pl.BlockSpec((1, L, c_pad), lambda n: (n, 0, 0))]

    def add_const(arr):
        idx = (0,) * arr.ndim
        operands.append(arr)
        in_specs.append(pl.BlockSpec(arr.shape, lambda n, idx=idx: idx))

    for blk in blocks:
        add_const(blk["w1"]); add_const(blk["b1"])
        add_const(blk["w2"]); add_const(blk["b2"])
        add_const(blk["alphas"])
        if blk["wd"] is not None:
            add_const(blk["wd"]); add_const(blk["bd"])
    add_const(params["wh"]); add_const(params["bh"])

    kern = functools.partial(_tcn_kernel, num_blocks=num_blocks, ksize=ksize,
                             has_ds=has_ds, seq_len=L, pad_rows=pad_rows)

    head = pl.pallas_call(
        kern,
        grid=(N,),
        out_shape=jax.ShapeDtypeStruct((N, 1, out_pad), jnp.float32),
        in_specs=in_specs,
        out_specs=pl.BlockSpec((1, 1, out_pad), lambda n: (n, 0, 0)),
        scratch_shapes=[pltpu.VMEM((pad_rows + L, c_pad), jnp.float32)],
        compiler_params=pltpu.CompilerParams(dimension_semantics=("parallel",)),
    )(*operands)

    return head[:, 0, :output_size]


# ---------------------------------------------------------------------------
# Parameter construction (deterministic, mirrors the nn.Module's shapes)
# ---------------------------------------------------------------------------
def _weight_norm_effective(v, g):
    # v: (Cout, Cin, k), g: (Cout,)  ->  W = g * v / ||v||   (norm over dims 1,2)
    norm = jnp.sqrt(jnp.sum(v * v, axis=(1, 2), keepdims=True))
    return g.reshape(-1, 1, 1) * v / norm


def init_tcn_params(key, input_size, output_size, num_channels, kernel_size):
    # One uniform lane-dense channel width for every block (all real widths <= 128 here).
    c_pad = _round_up(max([input_size] + list(num_channels)), LANE)
    out_pad = _round_up(output_size, LANE)

    blocks = []
    in_ch = input_size
    for out_ch in num_channels:
        key, k1, k2, k3, k4, k5, k6 = jax.random.split(key, 7)
        v1 = 0.01 * jax.random.normal(k1, (out_ch, in_ch, kernel_size), jnp.float32)
        g1 = jnp.sqrt(jnp.sum(v1 * v1, axis=(1, 2)))      # weight_norm g init = ||v||
        w1 = jnp.transpose(_weight_norm_effective(v1, g1), (2, 1, 0))   # (k, Cin, Cout)
        v2 = 0.01 * jax.random.normal(k3, (out_ch, out_ch, kernel_size), jnp.float32)
        g2 = jnp.sqrt(jnp.sum(v2 * v2, axis=(1, 2)))
        w2 = jnp.transpose(_weight_norm_effective(v2, g2), (2, 1, 0))   # (k, Cout, Cout)
        blk = {
            # tap-stacked weights: (k*C_pad, C_pad) so each conv is ONE matmul
            "w1": _pad_to(w1, (kernel_size, c_pad, c_pad)).reshape(kernel_size * c_pad,
                                                                   c_pad),
            "b1": _pad_to(0.05 * jax.random.normal(k2, (1, out_ch), jnp.float32),
                          (1, c_pad)),
            "w2": _pad_to(w2, (kernel_size, c_pad, c_pad)).reshape(kernel_size * c_pad,
                                                                   c_pad),
            "b2": _pad_to(0.05 * jax.random.normal(k4, (1, out_ch), jnp.float32),
                          (1, c_pad)),
            # PReLU alphas (a1, a2, a_out), default init 0.25, broadcast across channels
            "alphas": jnp.full((3, c_pad), 0.25, jnp.float32),
            "wd": None,
            "bd": None,
        }
        if in_ch != out_ch:                               # 1x1 downsample conv
            wd = 0.01 * jax.random.normal(k5, (out_ch, in_ch), jnp.float32)  # torch (out,in)
            blk["wd"] = _pad_to(jnp.transpose(wd), (c_pad, c_pad))
            blk["bd"] = _pad_to(0.05 * jax.random.normal(k6, (1, out_ch), jnp.float32),
                                (1, c_pad))
        blocks.append(blk)
        in_ch = out_ch

    key, kw, kb = jax.random.split(key, 3)
    w_lin = 0.1 * jax.random.normal(kw, (output_size, in_ch), jnp.float32)   # torch (out,in)
    b_lin = 0.1 * jax.random.normal(kb, (1, output_size), jnp.float32)
    return {
        "blocks": blocks,
        "wh": _pad_to(jnp.transpose(w_lin), (c_pad, out_pad)),
        "bh": _pad_to(b_lin, (1, out_pad)),
        "c_pad": c_pad,
        "output_size": output_size,
        "kernel_size": kernel_size,
    }


if __name__ == "__main__":
    # Small shapes consistent with the module's forward: (N, C_in, L)
    INPUT_SIZE = 4
    OUTPUT_SIZE = 3
    NUM_CHANNELS = [8, 8]
    KERNEL_SIZE = 2
    BATCH, SEQ_LEN = 2, 16

    key = jax.random.PRNGKey(0)
    key, kx, kp = jax.random.split(key, 3)
    inputs = jax.random.normal(kx, (BATCH, INPUT_SIZE, SEQ_LEN), jnp.float32)
    params = init_tcn_params(kp, INPUT_SIZE, OUTPUT_SIZE, NUM_CHANNELS, KERNEL_SIZE)

    forecast = tcn_forward(inputs, params)
    forecast = jax.block_until_ready(forecast)
    assert forecast.shape == (BATCH, OUTPUT_SIZE), forecast.shape
    assert bool(jnp.all(jnp.isfinite(forecast)))
    print("KERNEL_OK")
</pallas_src>

<mosaic_0001>
module attributes {stable_mosaic.version = 11 : i64} {
  func.func @_tcn_kernel(%arg0: i32, %arg1: memref<1x16x128xf32, #tpu.memory_space<vmem>>, %arg2: memref<256x128xf32, #tpu.memory_space<vmem>>, %arg3: memref<1x128xf32, #tpu.memory_space<vmem>>, %arg4: memref<256x128xf32, #tpu.memory_space<vmem>>, %arg5: memref<1x128xf32, #tpu.memory_space<vmem>>, %arg6: memref<3x128xf32, #tpu.memory_space<vmem>>, %arg7: memref<128x128xf32, #tpu.memory_space<vmem>>, %arg8: memref<1x128xf32, #tpu.memory_space<vmem>>, %arg9: memref<256x128xf32, #tpu.memory_space<vmem>>, %arg10: memref<1x128xf32, #tpu.memory_space<vmem>>, %arg11: memref<256x128xf32, #tpu.memory_space<vmem>>, %arg12: memref<1x128xf32, #tpu.memory_space<vmem>>, %arg13: memref<3x128xf32, #tpu.memory_space<vmem>>, %arg14: memref<128x128xf32, #tpu.memory_space<vmem>>, %arg15: memref<1x128xf32, #tpu.memory_space<vmem>>, %arg16: memref<1x1x128xf32, #tpu.memory_space<vmem>>, %arg17: memref<24x128xf32, #tpu.memory_space<vmem>>) attributes {dimension_semantics = [#tpu.dimension_semantics<parallel>], iteration_bounds = array<i64: 2>, scalar_prefetch = 0 : i64, scratch_operands = 1 : i64, tpu.core_type = #tpu.core_type<tc>, window_params = [{transform_indices = @transform_0, window_bounds = array<i64: 1, 16, 128>}, {pipeline_mode = #tpu.pipeline_mode<synchronous>, transform_indices = @transform_1, window_bounds = array<i64: 256, 128>}, {pipeline_mode = #tpu.pipeline_mode<synchronous>, transform_indices = @transform_2, window_bounds = array<i64: 1, 128>}, {pipeline_mode = #tpu.pipeline_mode<synchronous>, transform_indices = @transform_3, window_bounds = array<i64: 256, 128>}, {pipeline_mode = #tpu.pipeline_mode<synchronous>, transform_indices = @transform_4, window_bounds = array<i64: 1, 128>}, {pipeline_mode = #tpu.pipeline_mode<synchronous>, transform_indices = @transform_5, window_bounds = array<i64: 3, 128>}, {pipeline_mode = #tpu.pipeline_mode<synchronous>, transform_indices = @transform_6, window_bounds = array<i64: 128, 128>}, {pipeline_mode = #tpu.pipeline_mode<synchronous>, transform_indices = @transform_7, window_bounds = array<i64: 1, 128>}, {pipeline_mode = #tpu.pipeline_mode<synchronous>, transform_indices = @transform_8, window_bounds = array<i64: 256, 128>}, {pipeline_mode = #tpu.pipeline_mode<synchronous>, transform_indices = @transform_9, window_bounds = array<i64: 1, 128>}, {pipeline_mode = #tpu.pipeline_mode<synchronous>, transform_indices = @transform_10, window_bounds = array<i64: 256, 128>}, {pipeline_mode = #tpu.pipeline_mode<synchronous>, transform_indices = @transform_11, window_bounds = array<i64: 1, 128>}, {pipeline_mode = #tpu.pipeline_mode<synchronous>, transform_indices = @transform_12, window_bounds = array<i64: 3, 128>}, {pipeline_mode = #tpu.pipeline_mode<synchronous>, transform_indices = @transform_13, window_bounds = array<i64: 128, 128>}, {pipeline_mode = #tpu.pipeline_mode<synchronous>, transform_indices = @transform_14, window_bounds = array<i64: 1, 128>}, {transform_indices = @transform_15, window_bounds = array<i64: 1, 1, 128>}]} {
    %cst = arith.constant 0.000000e+00 : f32
    %0 = vector.broadcast %cst : f32 to vector<8x128xf32>
    %c0 = arith.constant 0 : index
    %c0_0 = arith.constant 0 : index
    %1 = vector.load %arg17[%c0, %c0_0] : memref<24x128xf32, #tpu.memory_space<vmem>>, vector<8x128xf32>
    tpu.vector_store %arg17[%c0, %c0_0], %0 {strides = array<i32>} : memref<24x128xf32, #tpu.memory_space<vmem>>, vector<8x128xf32>,
    %c0_1 = arith.constant 0 : index
    %c0_2 = arith.constant 0 : index
    %c0_3 = arith.constant 0 : index
    %2 = vector.load %arg1[%c0_1, %c0_2, %c0_3] : memref<1x16x128xf32, #tpu.memory_space<vmem>>, vector<1x16x128xf32>
    %3 = vector.shape_cast %2 : vector<1x16x128xf32> to vector<16x128xf32>
    %c0_4 = arith.constant 0 : index
    %c0_5 = arith.constant 0 : index
    %4 = vector.load %arg6[%c0_4, %c0_5] : memref<3x128xf32, #tpu.memory_space<vmem>>, vector<3x128xf32>
    %5 = vector.extract_strided_slice %4 {offsets = [0, 0], sizes = [1, 128], strides = [1, 1]} : vector<3x128xf32> to vector<1x128xf32>
    %6 = vector.extract_strided_slice %4 {offsets = [1, 0], sizes = [1, 128], strides = [1, 1]} : vector<3x128xf32> to vector<1x128xf32>
    %7 = vector.extract_strided_slice %4 {offsets = [2, 0], sizes = [1, 128], strides = [1, 1]} : vector<3x128xf32> to vector<1x128xf32>
    %c8 = arith.constant 8 : index
    %c0_6 = arith.constant 0 : index
    %8 = vector.load %arg17[%c8, %c0_6] : memref<24x128xf32, #tpu.memory_space<vmem>>, vector<16x128xf32>
    tpu.vector_store %arg17[%c8, %c0_6], %3 {strides = array<i32>} : memref<24x128xf32, #tpu.memory_space<vmem>>, vector<16x128xf32>,
    %c7 = arith.constant 7 : index
    %c0_7 = arith.constant 0 : index
    %9 = vector.load %arg17[%c7, %c0_7] : memref<24x128xf32, #tpu.memory_space<vmem>>, vector<16x128xf32>
    %c8_8 = arith.constant 8 : index
    %c0_9 = arith.constant 0 : index
    %10 = vector.load %arg17[%c8_8, %c0_9] : memref<24x128xf32, #tpu.memory_space<vmem>>, vector<16x128xf32>
    %11 = tpu.concatenate %9, %10 in 1 : vector<16x128xf32>, vector<16x128xf32> -> vector<16x256xf32>
    %c0_10 = arith.constant 0 : index
    %c0_11 = arith.constant 0 : index
    %12 = vector.load %arg2[%c0_10, %c0_11] : memref<256x128xf32, #tpu.memory_space<vmem>>, vector<256x128xf32>
    %cst_12 = arith.constant dense<0.000000e+00> : vector<16x128xf32>
    %13 = tpu.matmul %11, %12, %cst_12 {dimension_numbers = #tpu.dot_dimension_numbers<[1], [0], [0], [1], [0, 0, 1, 1], [], []>} : vector<16x256xf32>, vector<256x128xf32>, vector<16x128xf32> -> vector<16x128xf32>
    %c0_13 = arith.constant 0 : index
    %c0_14 = arith.constant 0 : index
    %14 = vector.load %arg3[%c0_13, %c0_14] : memref<1x128xf32, #tpu.memory_space<vmem>>, vector<1x128xf32>
    %15 = vector.broadcast %14 : vector<1x128xf32> to vector<16x128xf32>
    %16 = arith.addf %13, %15 : vector<16x128xf32>
    %cst_15 = arith.constant 0.000000e+00 : f32
    %17 = vector.broadcast %cst_15 : f32 to vector<16x128xf32>
    %18 = arith.cmpf oge, %16, %17 : vector<16x128xf32>
    %19 = vector.broadcast %5 : vector<1x128xf32> to vector<16x128xf32>
    %20 = arith.mulf %19, %16 : vector<16x128xf32>
    %21 = arith.select %18, %16, %20 : vector<16x128xi1>, vector<16x128xf32>
    %c8_16 = arith.constant 8 : index
    %c0_17 = arith.constant 0 : index
    %22 = vector.load %arg17[%c8_16, %c0_17] : memref<24x128xf32, #tpu.memory_space<vmem>>, vector<16x128xf32>
    tpu.vector_store %arg17[%c8_16, %c0_17], %21 {strides = array<i32>} : memref<24x128xf32, #tpu.memory_space<vmem>>, vector<16x128xf32>,
    %c7_18 = arith.constant 7 : index
    %c0_19 = arith.constant 0 : index
    %23 = vector.load %arg17[%c7_18, %c0_19] : memref<24x128xf32, #tpu.memory_space<vmem>>, vector<16x128xf32>
    %c8_20 = arith.constant 8 : index
    %c0_21 = arith.constant 0 : index
    %24 = vector.load %arg17[%c8_20, %c0_21] : memref<24x128xf32, #tpu.memory_space<vmem>>, vector<16x128xf32>
    %25 = tpu.concatenate %23, %24 in 1 : vector<16x128xf32>, vector<16x128xf32> -> vector<16x256xf32>
    %c0_22 = arith.constant 0 : index
    %c0_23 = arith.constant 0 : index
    %26 = vector.load %arg4[%c0_22, %c0_23] : memref<256x128xf32, #tpu.memory_space<vmem>>, vector<256x128xf32>
    %cst_24 = arith.constant dense<0.000000e+00> : vector<16x128xf32>
    %27 = tpu.matmul %25, %26, %cst_24 {dimension_numbers = #tpu.dot_dimension_numbers<[1], [0], [0], [1], [0, 0, 1, 1], [], []>} : vector<16x256xf32>, vector<256x128xf32>, vector<16x128xf32> -> vector<16x128xf32>
    %c0_25 = arith.constant 0 : index
    %c0_26 = arith.constant 0 : index
    %28 = vector.load %arg5[%c0_25, %c0_26] : memref<1x128xf32, #tpu.memory_space<vmem>>, vector<1x128xf32>
    %29 = vector.broadcast %28 : vector<1x128xf32> to vector<16x128xf32>
    %30 = arith.addf %27, %29 : vector<16x128xf32>
    %cst_27 = arith.constant 0.000000e+00 : f32
    %31 = vector.broadcast %cst_27 : f32 to vector<16x128xf32>
    %32 = arith.cmpf oge, %30, %31 : vector<16x128xf32>
    %33 = vector.broadcast %6 : vector<1x128xf32> to vector<16x128xf32>
    %34 = arith.mulf %33, %30 : vector<16x128xf32>
    %35 = arith.select %32, %30, %34 : vector<16x128xi1>, vector<16x128xf32>
    %c0_28 = arith.constant 0 : index
    %c0_29 = arith.constant 0 : index
    %36 = vector.load %arg7[%c0_28, %c0_29] : memref<128x128xf32, #tpu.memory_space<vmem>>, vector<128x128xf32>
    %cst_30 = arith.constant dense<0.000000e+00> : vector<16x128xf32>
    %37 = tpu.matmul %3, %36, %cst_30 {dimension_numbers = #tpu.dot_dimension_numbers<[1], [0], [0], [1], [0, 0, 1, 1], [], []>} : vector<16x128xf32>, vector<128x128xf32>, vector<16x128xf32> -> vector<16x128xf32>
    %c0_31 = arith.constant 0 : index
    %c0_32 = arith.constant 0 : index
    %38 = vector.load %arg8[%c0_31, %c0_32] : memref<1x128xf32, #tpu.memory_space<vmem>>, vector<1x128xf32>
    %39 = vector.broadcast %38 : vector<1x128xf32> to vector<16x128xf32>
    %40 = arith.addf %37, %39 : vector<16x128xf32>
    %41 = arith.addf %35, %40 : vector<16x128xf32>
    %cst_33 = arith.constant 0.000000e+00 : f32
    %42 = vector.broadcast %cst_33 : f32 to vector<16x128xf32>
    %43 = arith.cmpf oge, %41, %42 : vector<16x128xf32>
    %44 = vector.broadcast %7 : vector<1x128xf32> to vector<16x128xf32>
    %45 = arith.mulf %44, %41 : vector<16x128xf32>
    %46 = arith.select %43, %41, %45 : vector<16x128xi1>, vector<16x128xf32>
    %c0_34 = arith.constant 0 : index
    %c0_35 = arith.constant 0 : index
    %47 = vector.load %arg13[%c0_34, %c0_35] : memref<3x128xf32, #tpu.memory_space<vmem>>, vector<3x128xf32>
    %48 = vector.extract_strided_slice %47 {offsets = [0, 0], sizes = [1, 128], strides = [1, 1]} : vector<3x128xf32> to vector<1x128xf32>
    %49 = vector.extract_strided_slice %47 {offsets = [1, 0], sizes = [1, 128], strides = [1, 1]} : vector<3x128xf32> to vector<1x128xf32>
    %50 = vector.extract_strided_slice %47 {offsets = [2, 0], sizes = [1, 128], strides = [1, 1]} : vector<3x128xf32> to vector<1x128xf32>
    %c8_36 = arith.constant 8 : index
    %c0_37 = arith.constant 0 : index
    %51 = vector.load %arg17[%c8_36, %c0_37] : memref<24x128xf32, #tpu.memory_space<vmem>>, vector<16x128xf32>
    tpu.vector_store %arg17[%c8_36, %c0_37], %46 {strides = array<i32>} : memref<24x128xf32, #tpu.memory_space<vmem>>, vector<16x128xf32>,
    %c6 = arith.constant 6 : index
    %c0_38 = arith.constant 0 : index
    %52 = vector.load %arg17[%c6, %c0_38] : memref<24x128xf32, #tpu.memory_space<vmem>>, vector<16x128xf32>
    %c8_39 = arith.constant 8 : index
    %c0_40 = arith.constant 0 : index
    %53 = vector.load %arg17[%c8_39, %c0_40] : memref<24x128xf32, #tpu.memory_space<vmem>>, vector<16x128xf32>
    %54 = tpu.concatenate %52, %53 in 1 : vector<16x128xf32>, vector<16x128xf32> -> vector<16x256xf32>
    %c0_41 = arith.constant 0 : index
    %c0_42 = arith.constant 0 : index
    %55 = vector.load %arg9[%c0_41, %c0_42] : memref<256x128xf32, #tpu.memory_space<vmem>>, vector<256x128xf32>
    %cst_43 = arith.constant dense<0.000000e+00> : vector<16x128xf32>
    %56 = tpu.matmul %54, %55, %cst_43 {dimension_numbers = #tpu.dot_dimension_numbers<[1], [0], [0], [1], [0, 0, 1, 1], [], []>} : vector<16x256xf32>, vector<256x128xf32>, vector<16x128xf32> -> vector<16x128xf32>
    %c0_44 = arith.constant 0 : index
    %c0_45 = arith.constant 0 : index
    %57 = vector.load %arg10[%c0_44, %c0_45] : memref<1x128xf32, #tpu.memory_space<vmem>>, vector<1x128xf32>
    %58 = vector.broadcast %57 : vector<1x128xf32> to vector<16x128xf32>
    %59 = arith.addf %56, %58 : vector<16x128xf32>
    %cst_46 = arith.constant 0.000000e+00 : f32
    %60 = vector.broadcast %cst_46 : f32 to vector<16x128xf32>
    %61 = arith.cmpf oge, %59, %60 : vector<16x128xf32>
    %62 = vector.broadcast %48 : vector<1x128xf32> to vector<16x128xf32>
    %63 = arith.mulf %62, %59 : vector<16x128xf32>
    %64 = arith.select %61, %59, %63 : vector<16x128xi1>, vector<16x128xf32>
    %c8_47 = arith.constant 8 : index
    %c0_48 = arith.constant 0 : index
    %65 = vector.load %arg17[%c8_47, %c0_48] : memref<24x128xf32, #tpu.memory_space<vmem>>, vector<16x128xf32>
    tpu.vector_store %arg17[%c8_47, %c0_48], %64 {strides = array<i32>} : memref<24x128xf32, #tpu.memory_space<vmem>>, vector<16x128xf32>,
    %c6_49 = arith.constant 6 : index
    %c0_50 = arith.constant 0 : index
    %66 = vector.load %arg17[%c6_49, %c0_50] : memref<24x128xf32, #tpu.memory_space<vmem>>, vector<16x128xf32>
    %c8_51 = arith.constant 8 : index
    %c0_52 = arith.constant 0 : index
    %67 = vector.load %arg17[%c8_51, %c0_52] : memref<24x128xf32, #tpu.memory_space<vmem>>, vector<16x128xf32>
    %68 = tpu.concatenate %66, %67 in 1 : vector<16x128xf32>, vector<16x128xf32> -> vector<16x256xf32>
    %c0_53 = arith.constant 0 : index
    %c0_54 = arith.constant 0 : index
    %69 = vector.load %arg11[%c0_53, %c0_54] : memref<256x128xf32, #tpu.memory_space<vmem>>, vector<256x128xf32>
    %cst_55 = arith.constant dense<0.000000e+00> : vector<16x128xf32>
    %70 = tpu.matmul %68, %69, %cst_55 {dimension_numbers = #tpu.dot_dimension_numbers<[1], [0], [0], [1], [0, 0, 1, 1], [], []>} : vector<16x256xf32>, vector<256x128xf32>, vector<16x128xf32> -> vector<16x128xf32>
    %c0_56 = arith.constant 0 : index
    %c0_57 = arith.constant 0 : index
    %71 = vector.load %arg12[%c0_56, %c0_57] : memref<1x128xf32, #tpu.memory_space<vmem>>, vector<1x128xf32>
    %72 = vector.broadcast %71 : vector<1x128xf32> to vector<16x128xf32>
    %73 = arith.addf %70, %72 : vector<16x128xf32>
    %cst_58 = arith.constant 0.000000e+00 : f32
    %74 = vector.broadcast %cst_58 : f32 to vector<16x128xf32>
    %75 = arith.cmpf oge, %73, %74 : vector<16x128xf32>
    %76 = vector.broadcast %49 : vector<1x128xf32> to vector<16x128xf32>
    %77 = arith.mulf %76, %73 : vector<16x128xf32>
    %78 = arith.select %75, %73, %77 : vector<16x128xi1>, vector<16x128xf32>
    %79 = arith.addf %78, %46 : vector<16x128xf32>
    %cst_59 = arith.constant 0.000000e+00 : f32
    %80 = vector.broadcast %cst_59 : f32 to vector<16x128xf32>
    %81 = arith.cmpf oge, %79, %80 : vector<16x128xf32>
    %82 = vector.broadcast %50 : vector<1x128xf32> to vector<16x128xf32>
    %83 = arith.mulf %82, %79 : vector<16x128xf32>
    %84 = arith.select %81, %79, %83 : vector<16x128xi1>, vector<16x128xf32>
    %85 = vector.extract_strided_slice %84 {offsets = [15, 0], sizes = [1, 128], strides = [1, 1]} : vector<16x128xf32> to vector<1x128xf32>
    %c0_60 = arith.constant 0 : index
    %c0_61 = arith.constant 0 : index
    %86 = vector.load %arg14[%c0_60, %c0_61] : memref<128x128xf32, #tpu.memory_space<vmem>>, vector<128x128xf32>
    %cst_62 = arith.constant dense<0.000000e+00> : vector<1x128xf32>
    %87 = tpu.matmul %85, %86, %cst_62 {dimension_numbers = #tpu.dot_dimension_numbers<[1], [0], [0], [1], [0, 0, 1, 1], [], []>} : vector<1x128xf32>, vector<128x128xf32>, vector<1x128xf32> -> vector<1x128xf32>
    %c0_63 = arith.constant 0 : index
    %c0_64 = arith.constant 0 : index
    %88 = vector.load %arg15[%c0_63, %c0_64] : memref<1x128xf32, #tpu.memory_space<vmem>>, vector<1x128xf32>
    %89 = arith.addf %87, %88 : vector<1x128xf32>
    %c0_65 = arith.constant 0 : index
    %c0_66 = arith.constant 0 : index
    %c0_67 = arith.constant 0 : index
    %90 = vector.load %arg16[%c0_65, %c0_66, %c0_67] : memref<1x1x128xf32, #tpu.memory_space<vmem>>, vector<1x1x128xf32>
    %91 = vector.shape_cast %90 : vector<1x1x128xf32> to vector<1x128xf32>
    %92 = vector.shape_cast %89 : vector<1x128xf32> to vector<1x1x128xf32>
    tpu.vector_store %arg16[%c0_65, %c0_66, %c0_67], %92 {strides = array<i32>} : memref<1x1x128xf32, #tpu.memory_space<vmem>>, vector<1x1x128xf32>,
    return
  }
  func.func @transform_0(%arg0: i32) -> (i32, i32, i32) {
    %c0_i32 = arith.constant 0 : i32
    %c0_i32_0 = arith.constant 0 : i32
    %c0_i32_1 = arith.constant 0 : i32
    return %arg0, %c0_i32, %c0_i32_0 : i32, i32, i32
  }
  func.func @transform_1(%arg0: i32) -> (i32, i32) {
    %c0_i32 = arith.constant 0 : i32
    %c0_i32_0 = arith.constant 0 : i32
    %c0_i32_1 = arith.constant 0 : i32
    return %c0_i32, %c0_i32_0 : i32, i32
  }
  func.func @transform_2(%arg0: i32) -> (i32, i32) {
    %c0_i32 = arith.constant 0 : i32
    %c0_i32_0 = arith.constant 0 : i32
    %c0_i32_1 = arith.constant 0 : i32
    return %c0_i32, %c0_i32_0 : i32, i32
  }
  func.func @transform_3(%arg0: i32) -> (i32, i32) {
    %c0_i32 = arith.constant 0 : i32
    %c0_i32_0 = arith.constant 0 : i32
    %c0_i32_1 = arith.constant 0 : i32
    return %c0_i32, %c0_i32_0 : i32, i32
  }
  func.func @transform_4(%arg0: i32) -> (i32, i32) {
    %c0_i32 = arith.constant 0 : i32
    %c0_i32_0 = arith.constant 0 : i32
    %c0_i32_1 = arith.constant 0 : i32
    return %c0_i32, %c0_i32_0 : i32, i32
  }
  func.func @transform_5(%arg0: i32) -> (i32, i32) {
    %c0_i32 = arith.constant 0 : i32
    %c0_i32_0 = arith.constant 0 : i32
    %c0_i32_1 = arith.constant 0 : i32
    return %c0_i32, %c0_i32_0 : i32, i32
  }
  func.func @transform_6(%arg0: i32) -> (i32, i32) {
    %c0_i32 = arith.constant 0 : i32
    %c0_i32_0 = arith.constant 0 : i32
    %c0_i32_1 = arith.constant 0 : i32
    return %c0_i32, %c0_i32_0 : i32, i32
  }
  func.func @transform_7(%arg0: i32) -> (i32, i32) {
    %c0_i32 = arith.constant 0 : i32
    %c0_i32_0 = arith.constant 0 : i32
    %c0_i32_1 = arith.constant 0 : i32
    return %c0_i32, %c0_i32_0 : i32, i32
  }
  func.func @transform_8(%arg0: i32) -> (i32, i32) {
    %c0_i32 = arith.constant 0 : i32
    %c0_i32_0 = arith.constant 0 : i32
    %c0_i32_1 = arith.constant 0 : i32
    return %c0_i32, %c0_i32_0 : i32, i32
  }
  func.func @transform_9(%arg0: i32) -> (i32, i32) {
    %c0_i32 = arith.constant 0 : i32
    %c0_i32_0 = arith.constant 0 : i32
    %c0_i32_1 = arith.constant 0 : i32
    return %c0_i32, %c0_i32_0 : i32, i32
  }
  func.func @transform_10(%arg0: i32) -> (i32, i32) {
    %c0_i32 = arith.constant 0 : i32
    %c0_i32_0 = arith.constant 0 : i32
    %c0_i32_1 = arith.constant 0 : i32
    return %c0_i32, %c0_i32_0 : i32, i32
  }
  func.func @transform_11(%arg0: i32) -> (i32, i32) {
    %c0_i32 = arith.constant 0 : i32
    %c0_i32_0 = arith.constant 0 : i32
    %c0_i32_1 = arith.constant 0 : i32
    return %c0_i32, %c0_i32_0 : i32, i32
  }
  func.func @transform_12(%arg0: i32) -> (i32, i32) {
    %c0_i32 = arith.constant 0 : i32
    %c0_i32_0 = arith.constant 0 : i32
    %c0_i32_1 = arith.constant 0 : i32
    return %c0_i32, %c0_i32_0 : i32, i32
  }
  func.func @transform_13(%arg0: i32) -> (i32, i32) {
    %c0_i32 = arith.constant 0 : i32
    %c0_i32_0 = arith.constant 0 : i32
    %c0_i32_1 = arith.constant 0 : i32
    return %c0_i32, %c0_i32_0 : i32, i32
  }
  func.func @transform_14(%arg0: i32) -> (i32, i32) {
    %c0_i32 = arith.constant 0 : i32
    %c0_i32_0 = arith.constant 0 : i32
    %c0_i32_1 = arith.constant 0 : i32
    return %c0_i32, %c0_i32_0 : i32, i32
  }
  func.func @transform_15(%arg0: i32) -> (i32, i32, i32) {
    %c0_i32 = arith.constant 0 : i32
    %c0_i32_0 = arith.constant 0 : i32
    %c0_i32_1 = arith.constant 0 : i32
    return %arg0, %c0_i32, %c0_i32_0 : i32, i32, i32
  }
}

</mosaic_0001>

<bundles_post_ra>
// kernel: tpu_custom_call.1
= control target key start
LH: loop header
LB: loop body
LE: loop exit
PB: predicated region body
PF: predicated region fallthrough
CT: control target
= control target key end

     0   :  { %s2836_s0 = inlined_call_operand.hbm [shape: f32[2,16,128], index: 0, kind: input, shape index: {}]   ;;  %s2837_s1 = inlined_call_operand.hbm [shape: f32[256,128], index: 1, kind: input, shape index: {}]   ;;  %s2838_s2 = inlined_call_operand.vmem [shape: f32[1,128], index: 2, kind: input, shape index: {}]   ;;  %s2839_s3 = inlined_call_operand.hbm [shape: f32[256,128], index: 3, kind: input, shape index: {}]   ;;  %s2840_s4 = inlined_call_operand.vmem [shape: f32[1,128], index: 4, kind: input, shape index: {}]   ;;  %s2841_s5 = inlined_call_operand.vmem [shape: f32[3,128], index: 5, kind: input, shape index: {}]   ;;  %s2842_s6 = inlined_call_operand.hbm [shape: f32[128,128], index: 6, kind: input, shape index: {}]   ;;  %s2843_s7 = inlined_call_operand.vmem [shape: f32[1,128], index: 7, kind: input, shape index: {}]   ;;  %s2844_s8 = inlined_call_operand.hbm [shape: f32[256,128], index: 8, kind: input, shape index: {}]   ;;  %s2845_s9 = inlined_call_operand.vmem [shape: f32[1,128], index: 9, kind: input, shape index: {}]   ;;  %s2846_s10 = inlined_call_operand.hbm [shape: f32[256,128], index: 10, kind: input, shape index: {}]   ;;  %s2847_s11 = inlined_call_operand.vmem [shape: f32[1,128], index: 11, kind: input, shape index: {}]   ;;  %s2848_s12 = inlined_call_operand.vmem [shape: f32[3,128], index: 12, kind: input, shape index: {}]   ;;  %s2849_s13 = inlined_call_operand.hbm [shape: f32[128,128], index: 13, kind: input, shape index: {}]   ;;  %s2850_s14 = inlined_call_operand.vmem [shape: f32[1,128], index: 14, kind: input, shape index: {}]   ;;  %s2851_s15 = inlined_call_operand.hbm [shape: f32[2,1,128], index: 15, kind: output, shape index: {}]  }
   0x1   :  { %2857 = sst [smem:[#allocation21_spill]] %s2837_s1 }
   0x2   :  { %2858 = sst [smem:[#allocation22_spill]] %s2840_s4 }
   0x3   :  { %2859 = sst [smem:[#allocation23_spill]] %s2843_s7 }
   0x4   :  { %2860 = sst [smem:[#allocation24_spill]] %s2845_s9 }
   0x5   :  { %2861 = sst [smem:[#allocation25_spill]] %s2847_s11 }
   0x6   :  { %2862 = sst [smem:[#allocation26_spill]] %s2848_s12 }
   0x7   :  { %2863 = sst [smem:[#allocation27_spill]] %s2850_s14 }
   0x8   :  { %2864 = sst [smem:[#allocation28_spill]] %s2851_s15 }
   0x9   :  { %20 = vsyncpa [#allocation4], 0 }
   0xa   :  { %22 = vsyncpa [#allocation4 + $0x1], 0 }
   0xb   :  { %23 = vsyncpa [#allocation7], 0 }
   0xc   :  { %24 = vsyncpa [#allocation10], 0 }
   0xd   :  { %25 = vsyncpa [#allocation13], 0 }
   0xe   :  { %26 = vsyncpa [#allocation5], 0 }
   0xf   :  { %28 = vsyncpa [#allocation5 + $0x1], 0  ;;  %s2418_s18 = smov 0   ;;  %s2420_s19 = smov 0  }
  0x10   :  { %s2422_s20 = smov 0   ;;  %s2424_s21 = smov 0  }
  0x11 LB: > { %s2325_s22 = smov [#allocation6]   ;;  %s2439_s24 = sadd.s32 4294967295, %s2323_s21   ;;  %s2323_s21 = sphi %s2424_s21, %s2896_s21   ;;  %s2319_s20 = sphi %s2422_s20, %s2895_s20   ;;  %s2315_s19 = sphi %s2420_s19, %s2894_s19   ;;  %s2311_s18 = sphi %s2418_s18, %s2893_s18  }
  0x12   : > { %s397_s23 = sshll.u32 %s2325_s22, 4  ;;  %p1466_p0 = scmp.ge.s32.totalorder %s2323_s21, 1  ;;  %s2444_s23 = int_to_ptr.vmem [resolvable:$true] %s397_s23 }
  0x13   : > { %p2853_p1 = scmp.eq.s32.totalorder %s2439_s24, 0  ;;  %p385_p2 = scmp.lt.s32.totalorder %s2323_s21, 3 }
  0x14   : > { %s2326_s26 = smov [#allocation9]   ;;  %s2327_s29 = smov [#allocation12]  }
  0x15   : > { %p2446_p3 = pnand %p1466_p0, %p385_p2  ;;  %s432_s27 = sshll.u32 %s2326_s26, 4  ;;  %s2459_s27 = int_to_ptr.vmem [resolvable:$true] %s432_s27 }
  0x16   : > { %s464_s30 = sshll.u32 %s2327_s29, 4  ;;  %s2867_s1 = sld [smem:[#allocation21_spill]]  ;;  %s2461_s30 = int_to_ptr.vmem [resolvable:$true] %s464_s30 }
  0x17   : > { %s2865_s25 = scalar_select %p2446_p3, 1, 0 }
  0x18   : > { %p1963_p5 = pneg %p2446_p3 }
  0x1a   : > { %p2455_p6 = pnand %p1963_p5, %p2853_p1 }
  0x1c   : > { %s2047_s22 = scalar_lea.hbm %s2867_s1, 4096  ;;  %p2471_p8 = pneg %p2455_p6 }
  0x1d   : > { %p2048_p7 = scmp.ne.s32.totalorder %s2867_s1, %s2047_s22  ;;  %p2054_p11 = scmp.lt.u32.totalorder %s2047_s22, %s2867_s1 }
  0x1f   : > { %p2050_p9 = pnand %p2471_p8, %p2048_p7 }
  0x21   : > { %p2051_p10 = pneg %p2050_p9 }
  0x23   : > { %p2056_p12 = pnand %p2054_p11, %p2051_p10 }
  0x25   : > { %2059 = shalt.err (!%p2056_p12)
}
  0x26   : > { %s2060_s14 = scalar_lea.vmem %s2444_s23, 4096  ;;  %p2068_p5 = scmp.lt.s32.totalorder %s2444_s23, %s2444_s23 }
  0x27   : > { %p2061_p13 = scmp.ne.s32.totalorder %s2444_s23, %s2060_s14  ;;  %p2069_p4 = scmp.lt.s32.totalorder %s2060_s14, %s2060_s14 }
  0x29   : > { %p2063_p0 = pnand %p2061_p13, %p2471_p8  ;;  %p2070_p7 = por %p2069_p4, %p2068_p5 }
  0x2b   : > { %p2064_p2 = pneg %p2063_p0 }
  0x2d   : > { %p2071_p9 = pnand %p2070_p7, %p2064_p2 }
  0x2f   : > { %2074 = shalt.err (!%p2071_p9)
}
  0x30   : > { %s2855_s15 = smov 128   ;;  %s2329_s11 = smov 8  }
  0x31   : > { %1966 = dma.hbm_to_vmem [thread:$0]  (!%p2455_p6), %s2867_s1, 4096, %s2444_s23, [#allocation7], %s2855_s15, %s2855_s15, %s2329_s11  }
  0x32   : > { %s2075_s14 = scalar_lea.hbm %s2842_s6, 2048 }
  0x33   : > { %p2076_p4 = scmp.ne.s32.totalorder %s2842_s6, %s2075_s14  ;;  %p2082_p12 = scmp.lt.u32.totalorder %s2075_s14, %s2842_s6 }
  0x35   : > { %p2078_p10 = pnand %p2076_p4, %p2471_p8 }
  0x37   : > { %p2079_p11 = pneg %p2078_p10 }
  0x39   : > { %p2084_p13 = pnand %p2082_p12, %p2079_p11 }
  0x3b   : > { %2087 = shalt.err (!%p2084_p13)
}
  0x3c   : > { %s2088_s23 = scalar_lea.vmem %s2459_s27, 2048  ;;  %p2096_p7 = scmp.lt.s32.totalorder %s2459_s27, %s2459_s27 }
  0x3d   : > { %p2089_p0 = scmp.ne.s32.totalorder %s2459_s27, %s2088_s23  ;;  %p2097_p9 = scmp.lt.s32.totalorder %s2088_s23, %s2088_s23 }
  0x3f   : > { %p2091_p2 = pnand %p2089_p0, %p2471_p8  ;;  %p2098_p4 = por %p2097_p9, %p2096_p7 }
  0x41   : > { %p2092_p5 = pneg %p2091_p2 }
  0x43   : > { %p2099_p10 = pnand %p2098_p4, %p2092_p5 }
  0x45   : > { %2102 = shalt.err (!%p2099_p10)
}
  0x46   : > { %1972 = dma.hbm_to_vmem [thread:$0]  (!%p2455_p6), %s2842_s6, 2048, %s2459_s27, [#allocation10], %s2855_s15, %s2855_s15, %s2329_s11  }
  0x47   : > { %s2103_s16 = scalar_lea.hbm %s2846_s10, 4096 }
  0x48   : > { %p2104_p11 = scmp.ne.s32.totalorder %s2846_s10, %s2103_s16  ;;  %p2110_p0 = scmp.lt.u32.totalorder %s2103_s16, %s2846_s10 }
  0x4a   : > { %p2106_p12 = pnand %p2104_p11, %p2471_p8 }
  0x4c   : > { %p2107_p13 = pneg %p2106_p12 }
  0x4e   : > { %p2112_p2 = pnand %p2110_p0, %p2107_p13 }
  0x50   : > { %2115 = shalt.err (!%p2112_p2)
}
  0x51   : > { %s2116_s27 = scalar_lea.vmem %s2461_s30, 4096  ;;  %p2124_p4 = scmp.lt.s32.totalorder %s2461_s30, %s2461_s30 }
  0x52   : > { %p2117_p5 = scmp.ne.s32.totalorder %s2461_s30, %s2116_s27  ;;  %p2125_p10 = scmp.lt.s32.totalorder %s2116_s27, %s2116_s27 }
  0x54   : > { %p2119_p7 = pnand %p2117_p5, %p2471_p8  ;;  %p2126_p11 = por %p2125_p10, %p2124_p4 }
  0x56   : > { %p2120_p9 = pneg %p2119_p7 }
  0x58   : > { %p2127_p12 = pnand %p2126_p11, %p2120_p9 }
  0x5a   : > { %2130 = shalt.err (!%p2127_p12)
}
  0x5b   : > { %1978 = dma.hbm_to_vmem [thread:$0]  (!%p2455_p6), %s2846_s10, 4096, %s2461_s30, [#allocation13], %s2855_s15, %s2855_s15, %s2329_s11  }
  0x5c   : > { %s2330_s7 = smov [#allocation8]   ;;  %s2331_s12 = smov [#allocation11]  }
  0x5d   : > { %s413_s9 = sshll.u32 %s2330_s7, 4  ;;  %s448_s16 = sshll.u32 %s2331_s12, 4  ;;  %s414_s9 = int_to_ptr.vmem [resolvable:$true] %s413_s9  ;;  %s449_s16 = int_to_ptr.vmem [resolvable:$true] %s448_s16 }
  0x5e   : > { %s2131_s29 = scalar_lea.hbm %s2839_s3, 4096 }
  0x5f   : > { %p2132_p13 = scmp.ne.s32.totalorder %s2839_s3, %s2131_s29  ;;  %p2138_p5 = scmp.lt.u32.totalorder %s2131_s29, %s2839_s3 }
  0x61   : > { %p2134_p0 = pnand %p2132_p13, %p2471_p8 }
  0x63   : > { %p2135_p2 = pneg %p2134_p0 }
  0x65   : > { %p2140_p7 = pnand %p2138_p5, %p2135_p2 }
  0x67   : > { %2143 = shalt.err (!%p2140_p7)
}
  0x68   : > { %s2144_s30 = scalar_lea.vmem %s414_s9, 4096  ;;  %p2152_p11 = scmp.lt.s32.totalorder %s414_s9, %s414_s9 }
  0x69   : > { %p2145_p9 = scmp.ne.s32.totalorder %s414_s9, %s2144_s30  ;;  %p2153_p12 = scmp.lt.s32.totalorder %s2144_s30, %s2144_s30 }
  0x6b   : > { %p2147_p4 = pnand %p2145_p9, %p2471_p8  ;;  %p2154_p1 = por %p2153_p12, %p2152_p11 }
  0x6d   : > { %p2148_p10 = pneg %p2147_p4 }
  0x6f   : > { %p2155_p3 = pnand %p2154_p1, %p2148_p10 }
  0x71   : > { %2158 = shalt.err (!%p2155_p3)
}
  0x72   : > { %1969 = dma.hbm_to_vmem [thread:$0]  (!%p2455_p6), %s2839_s3, 4096, %s414_s9, [#allocation7], %s2855_s15, %s2855_s15, %s2329_s11  }
  0x73   : > { %s2159_s17 = scalar_lea.hbm %s2844_s8, 4096 }
  0x74   : > { %p2160_p1 = scmp.ne.s32.totalorder %s2844_s8, %s2159_s17  ;;  %p2166_p0 = scmp.lt.u32.totalorder %s2159_s17, %s2844_s8 }
  0x76   : > { %p2162_p3 = pnand %p2160_p1, %p2471_p8 }
  0x78   : > { %p2163_p13 = pneg %p2162_p3 }
  0x7a   : > { %p2168_p2 = pnand %p2166_p0, %p2163_p13 }
  0x7c   : > { %2171 = shalt.err (!%p2168_p2)
}
  0x7d   : > { %s2172_s23 = scalar_lea.vmem %s449_s16, 4096  ;;  %p2180_p4 = scmp.lt.s32.totalorder %s449_s16, %s449_s16 }
  0x7e   : > { %p2173_p5 = scmp.ne.s32.totalorder %s449_s16, %s2172_s23  ;;  %p2181_p10 = scmp.lt.s32.totalorder %s2172_s23, %s2172_s23 }
  0x80   : > { %p2175_p7 = pnand %p2173_p5, %p2471_p8  ;;  %p2182_p11 = por %p2181_p10, %p2180_p4 }
  0x82   : > { %p2176_p9 = pneg %p2175_p7 }
  0x84   : > { %p2183_p12 = pnand %p2182_p11, %p2176_p9 }
  0x86   : > { %2186 = shalt.err (!%p2183_p12)
}
  0x87   : > { %1975 = dma.hbm_to_vmem [thread:$0]  (!%p2455_p6), %s2844_s8, 4096, %s449_s16, [#allocation10], %s2855_s15, %s2855_s15, %s2329_s11  }
  0x88   : > { %s2332_s1 = smov [#allocation14]   ;;  %s2187_s17 = scalar_lea.hbm %s2849_s13, 2048 }
  0x89   : > { %s483_s4 = sshll.u32 %s2332_s1, 4  ;;  %p2188_p1 = scmp.ne.s32.totalorder %s2849_s13, %s2187_s17  ;;  %s484_s4 = int_to_ptr.vmem [resolvable:$true] %s483_s4 }
  0x8a   : > { %p2194_p0 = scmp.lt.u32.totalorder %s2187_s17, %s2849_s13 }
  0x8b   : > { %p2190_p3 = pnand %p2188_p1, %p2471_p8 }
  0x8d   : > { %p2191_p13 = pneg %p2190_p3 }
  0x8f   : > { %p2196_p2 = pnand %p2194_p0, %p2191_p13 }
  0x91   : > { %2199 = shalt.err (!%p2196_p2)
}
  0x92   : > { %s2200_s16 = scalar_lea.vmem %s484_s4, 2048  ;;  %p2208_p4 = scmp.lt.s32.totalorder %s484_s4, %s484_s4 }
  0x93   : > { %p2201_p5 = scmp.ne.s32.totalorder %s484_s4, %s2200_s16  ;;  %p2209_p10 = scmp.lt.s32.totalorder %s2200_s16, %s2200_s16 }
  0x95   : > { %p2203_p7 = pnand %p2201_p5, %p2471_p8  ;;  %p2210_p11 = por %p2209_p10, %p2208_p4 }
  0x97   : > { %p2204_p9 = pneg %p2203_p7 }
  0x99   : > { %p2211_p12 = pnand %p2210_p11, %p2204_p9 }
  0x9b   : > { %2214 = shalt.err (!%p2211_p12)
}
  0x9c   : > { %1981 = dma.hbm_to_vmem [thread:$0]  (!%p2455_p6), %s2849_s13, 2048, %s484_s4, [#allocation13], %s2855_s15, %s2855_s15, %s2329_s11  }
  0x9d   : > { %s1465_s28 = sadd.s32 4294967294, %s2323_s21   ;;  %s2612_s26 = sadd.s32 1, %s2323_s21  }
  0x9e   : > { %s38_s30 = ssub.s32 %s2323_s21, %s2612_s26  ;;  %s41_s1 = sadd.s32 1, %s2319_s20 }
  0x9f   : > { %p39_p8 = scmp.eq.s32.totalorder %s38_s30, 0  ;;  %p48_p1 = scmp.ne.s32.totalorder %s2319_s20, %s2315_s19 }
  0xa0   : > { %p49_p3 = scmp.eq.s32.totalorder %s2323_s21, 0  ;;  %p54_p13 = scmp.ne.s32.totalorder %s2315_s19, %s2311_s18 }
  0xa1   : > { %s2623_s7 = scalar_select %p39_p8, %s2319_s20, %s41_s1  }
  0xa2   : > { %p2625_p0 = por %p49_p3, %p48_p1  ;;  %p2870_p2 = scmp.eq.s32.totalorder %s2439_s24, 0 }
  0xa3   : > { %p372_p5 = scmp.eq.s32.totalorder %s2439_s24, 1  ;;  %p378_p7 = scmp.eq.s32.totalorder %s1465_s28, 1 }
  0xa4   : > { %p2631_p6 = por %p2870_p2, %p54_p13  ;;  %p1996_p9 = scmp.lt.s32.totalorder %s2323_s21, 2 }
  0xa5   : > { %s500_s17 = sand.u32 1, %s2319_s20   ;;  %p2638_p4 = por %p372_p5, %p48_p1 }
  0xa6   : > { %p2642_p10 = por %p378_p7, %p54_p13  ;;  %s1474_s14 = sshll.u32 %s500_s17, 4 }
  0xa7   : > { %s2872_s22 = scalar_select %p2638_p4, 1, 0 }
  0xa8   : > { %s2873_s29 = scalar_select %p2642_p10, 1, 0 }
  0xa9   : > { %s1493_s27 = sshll.u32 %s2323_s21, 8  ;;  %s504_s28 = scalar_lea.vmem [#allocation3], %s1474_s14 }
  0xaa   : > { %s2650_s9 = scalar_lea.hbm %s2836_s0, %s1493_s27  ;;  %s511_s30 = sshll.u32 %s504_s28, 4  ;;  %s2652_s30 = int_to_ptr.vmem [resolvable:$true] %s511_s30 }
  0xab   : > { %p2656_p11 = pnand %p1996_p9, %p2625_p0  ;;  %s2660_s15 = scalar_lea.sflag [#allocation4], %s500_s17 }
  0xac   : > { %s2215_s16 = scalar_lea.hbm %s2650_s9, 256  ;;  %s2220_s12 = scalar_lea.hbm %s2836_s0, 512 }
  0xad   : > { %p2216_p12 = scmp.ne.s32.totalorder %s2650_s9, %s2215_s16  ;;  %p2217_p8 = pneg %p2656_p11 }
  0xae   : > { %p2221_p13 = scmp.lt.u32.totalorder %s2650_s9, %s2836_s0  ;;  %p2222_p0 = scmp.lt.u32.totalorder %s2220_s12, %s2215_s16 }
  0xaf   : > { %p2218_p1 = pnand %p2217_p8, %p2216_p12  ;;  %p2224_p5 = scmp.lt.u32.totalorder %s2215_s16, %s2650_s9 }
  0xb0   : > { %p2223_p2 = por %p2222_p0, %p2221_p13 }
  0xb1   : > { %p2219_p3 = pneg %p2218_p1 }
  0xb2   : > { %p2225_p7 = por %p2224_p5, %p2223_p2 }
  0xb4   : > { %p2226_p9 = pnand %p2225_p7, %p2219_p3 }
  0xb6   : > { %2229 = shalt.err (!%p2226_p9)
}
  0xb7   : > { %s2230_s17 = scalar_lea.vmem %s2652_s30, 256  ;;  %s2333_s14 = smov [#allocation3]  }
  0xb8   : > { %p2231_p12 = scmp.ne.s32.totalorder %s2652_s30, %s2230_s17  ;;  %s2235_s27 = sshll.u32 %s2333_s14, 4  ;;  %s2236_s27 = int_to_ptr.vmem [resolvable:$false] %s2235_s27 }
  0xb9   : > { %s2237_s23 = scalar_lea.vmem %s2236_s27, 512  ;;  %p2238_p4 = scmp.lt.s32.totalorder %s2652_s30, %s2236_s27 }
  0xba   : > { %p2233_p1 = pnand %p2231_p12, %p2217_p8  ;;  %p2239_p13 = scmp.lt.s32.totalorder %s2237_s23, %s2230_s17 }
  0xbc   : > { %p2234_p10 = pneg %p2233_p1  ;;  %p2240_p0 = por %p2239_p13, %p2238_p4 }
  0xbe   : > { %p2241_p2 = pnand %p2240_p0, %p2234_p10 }
  0xc0   : > { %2244 = shalt.err (!%p2241_p2)
}
  0xc1   : > { %s2875_s16 = smov 128   ;;  %p2876_p8 = scmp.ne.s32.totalorder %s2865_s25, 0 }
  0xc2   : > { %1985 = dma.hbm_to_vmem [thread:$0]  (!%p2656_p11), %s2650_s9, 256, %s2652_s30, %s2660_s15, %s2875_s16, %s2875_s16, %s2329_s11  }
  0xc3   : > { %523 = sbr.rel (%p2876_p8) target bundleno = 1396 (0x574), region = 80  ;;  %s2694_s12 = sand.u32 (!%p2876_p8), 1, %s2315_s19  }
  0xc4   : > { %s1478_s28 = sshll.u32 (!%p2876_p8), %s2694_s12, 4  ;;  %s526_s17 = scalar_lea.sflag (!%p2876_p8), [#allocation4], %s2694_s12 }
  0xc5   : > { %s2698_s14 = scalar_lea.vmem (!%p2876_p8), [#allocation3], %s1478_s28 }
  0xca   : > { %2290 = dma.done.wait (%p2631_p6), %s526_s17, 256  }
  0xcb   : > { %2292 = vsyncadd (%p2631_p6), %s526_s17, 4294967040  ;;  %p2877_p4 = scmp.eq.s32.totalorder %s2439_s24, 0 }
  0xcd   : > { %2294 = dma.done.wait (%p2877_p4), [#allocation7], 8192   ;;  %p2878_p10 = pmov %p2877_p4 }
  0xce   : > { %p2879_p11 = pmov %p2877_p4 }
  0xcf   : > { %2296 = vsyncadd (%p2878_p10), [#allocation7], 4294959104 }
  0xd0   : > { %2298 = dma.done.wait (%p2879_p11), [#allocation10], 6144   ;;  %p2880_p3 = pmov %p2877_p4 }
  0xd2   : > { %2300 = vsyncadd (%p2880_p3), [#allocation10], 4294961152  ;;  %p2881_p5 = pmov %p2880_p3 }
  0xd3   : > { %p2882_p7 = pmov %p2880_p3 }
  0xd4   : > { %2302 = dma.done.wait (%p2881_p5), [#allocation13], 6144  }
  0xd5   : > { %2304 = vsyncadd (%p2882_p7), [#allocation13], 4294961152  ;;  %v2334_v0 = vmov 0.0   ;;  %v625_v1 = vld [vmem:[#allocation6 + $0x80] sm:$0xff]  ;;  %v626_v2 = vld [vmem:[#allocation6 + $0x88] sm:$0xff]  ;;  %s2883_s1 = sld [smem:[#allocation22_spill]] }
  0xd6   : > { %599 = vst [vmem:[#allocation2] sm:$0xff] %v2334_v0  ;;  %v609_v3 = vld [vmem:[#allocation6] sm:$0xff]  ;;  %v1751_v4 = vpack.c.bf16 %v626_v2, %v625_v1  ;;  %v610_v5 = vld [vmem:[#allocation6 + $0x8] sm:$0xff]  ;;  %v627_v6 = vld [vmem:[#allocation6 + $0x90] sm:$0xff]  ;;  %s2884_s16 = sld [smem:[#allocation23_spill]]  ;;  %s2886_s11 = sld [smem:[#allocation24_spill]] }
  0xd7   : > { %v628_v7 = vld [vmem:[#allocation6 + $0x98] sm:$0xff]  ;;  %v1753_v8 = vpack.c.bf16 %v610_v5, %v609_v3  ;;  %v611_v10 = vld [vmem:[#allocation6 + $0x10] sm:$0xff]  ;;  %v629_v12 = vld [vmem:[#allocation6 + $0xa0] sm:$0xff]  ;;  %vm2336_vm8 = vmmov 0   ;;  %s2887_s30 = sld [smem:[#allocation25_spill]]  ;;  %s2888_s23 = sld [smem:[#allocation27_spill]] }
  0xd8   : > { %v1755_v9 = vpack.c.bf16 %v628_v7, %v627_v6  ;;  %v612_v11 = vld [vmem:[#allocation6 + $0x18] sm:$0xff]  ;;  %1752 = vmatprep.subr.bf16.mxu0 %v1751_v4  ;;  %v630_v13 = vld [vmem:[#allocation6 + $0xa8] sm:$0xff]  ;;  %v613_v16 = vld [vmem:[#allocation6 + $0x20] sm:$0xff]  ;;  %s598_s28 = scalar_lea.vmem [#allocation15], %s2694_s12  ;;  %s2889_s15 = sld [smem:[#allocation28_spill]] }
  0xd9   : > { %1754 = vmatpush3.bf16.msra.mxu0 %v1753_v8  ;;  %v1757_v14 = vpack.c.bf16 %v612_v11, %v611_v10  ;;  %v1759_v15 = vpack.c.bf16 %v630_v13, %v629_v12  ;;  %v614_v17 = vld [vmem:[#allocation6 + $0x28] sm:$0xff]  ;;  %v631_v18 = vld [vmem:[#allocation6 + $0xb0] sm:$0xff]  ;;  %v632_v19 = vld [vmem:[#allocation6 + $0xb8] sm:$0xff]  ;;  %s1342_s17 = sshll.u32 %s598_s28, 4  ;;  %s1330_s4 = scalar_lea.sflag [#allocation5], %s2694_s12  ;;  %s2794_s17 = int_to_ptr.vmem [resolvable:$true] %s1342_s17 }
  0xda   : > { %1756 = vmatprep.subr.bf16.mxu0 %v1755_v9  ;;  %v1761_v20 = vpack.c.bf16 %v614_v17, %v613_v16  ;;  %v1763_v21 = vpack.c.bf16 %v632_v19, %v631_v18  ;;  %v615_v22 = vld [vmem:[#allocation6 + $0x30] sm:$0xff]  ;;  %v616_v23 = vld [vmem:[#allocation6 + $0x38] sm:$0xff]  ;;  %v633_v24 = vld [vmem:[#allocation6 + $0xc0] sm:$0xff]  ;;  %s2245_s9 = scalar_lea.vmem %s2794_s17, 16  ;;  %p2890_p9 = scmp.ne.s32.totalorder %s2872_s22, 0 }
  0xdb   : > { %v634_v25 = vld [vmem:[#allocation6 + $0xc8] sm:$0xff]  ;;  %v2718_v26 = vld [vmem:[%s2698_s14] sm:$0xff]  ;;  %v1765_v32 = vpack.c.bf16 %v616_v23, %v615_v22  ;;  %v636_v39 = vld [vmem:[#allocation6 + $0xd8] sm:$0xff]  ;;  %p2246_p6 = scmp.ne.s32.totalorder %s2794_s17, %s2245_s9 }
  0xdc   : > { %v617_v27 = vld [vmem:[#allocation6 + $0x40] sm:$0xff]  ;;  %v618_v28 = vld [vmem:[#allocation6 + $0x48] sm:$0xff]  ;;  %603 = vst [vmem:[#allocation2 + $0x8] sm:$0xff] %v2718_v26  ;;  %712 = vmatprep.mubr.f32.mxu0 %v2718_v26  ;;  %v757_v36 = vld [vmem:[#allocation8 + $0x90] sm:$0xff]  ;;  %v1767_v37 = vpack.c.bf16 %v634_v25, %v633_v24 }
  0xdd   : > { %1758 = vmatpush3.bf16.msra.mxu0 %v1757_v14  ;;  %v2723_v29 = vld [vmem:[%s2698_s14 + $0x8] sm:$0xff]  ;;  %v755_v30 = vld [vmem:[#allocation8 + $0x80] sm:$0xff]  ;;  %v635_v38 = vld [vmem:[#allocation6 + $0xd0] sm:$0xff]  ;;  %v1769_v48 = vpack.c.bf16 %v618_v28, %v617_v27  ;;  %s2885_s14 = sld [smem:[#allocation26_spill]]  ;;  %p2247_p12 = pnand %p2246_p6, %p2890_p9 }
  0xde   : > { %1760 = vmatprep.subr.bf16.mxu0 %v1759_v15  ;;  %v756_v31 = vld [vmem:[#allocation8 + $0x88] sm:$0xff]  ;;  %604 = vst [vmem:[#allocation2 + $0x10] sm:$0xff] %v2723_v29  ;;  %v739_v34 = vld [vmem:[#allocation8] sm:$0xff]  ;;  %v758_v41 = vld [vmem:[#allocation8 + $0x98] sm:$0xff]  ;;  %v1771_v53 = vpack.c.bf16 %v636_v39, %v635_v38 }
  0xdf   : > { %v1783_v33 = vpack.c.bf16 %v756_v31, %v755_v30  ;;  %v740_v35 = vld [vmem:[#allocation8 + $0x8] sm:$0xff]  ;;  %v1787_v42 = vpack.c.bf16 %v758_v41, %v757_v36  ;;  %v741_v43 = vld [vmem:[#allocation8 + $0x10] sm:$0xff]  ;;  %v742_v44 = vld [vmem:[#allocation8 + $0x18] sm:$0xff]  ;;  %p2248_p1 = pneg %p2247_p12 }
  0xe0   : > { %v1785_v40 = vpack.c.bf16 %v740_v35, %v739_v34  ;;  %v759_v45 = vld [vmem:[#allocation8 + $0xa0] sm:$0xff]  ;;  %v1789_v46 = vpack.c.bf16 %v742_v44, %v741_v43  ;;  %v760_v47 = vld [vmem:[#allocation8 + $0xa8] sm:$0xff]  ;;  %v619_v49 = vld [vmem:[#allocation6 + $0x50] sm:$0xff] }
  0xe1   : > { %1762 = vmatpush3.bf16.msra.mxu0 %v1761_v20  ;;  %1784 = vmatprep.subr.bf16.mxu1 %v1783_v33  ;;  %v1791_v50 = vpack.c.bf16 %v760_v47, %v759_v45  ;;  %v743_v51 = vld [vmem:[#allocation8 + $0x20] sm:$0xff]  ;;  %v744_v52 = vld [vmem:[#allocation8 + $0x28] sm:$0xff]  ;;  %v620_v54 = vld [vmem:[#allocation6 + $0x58] sm:$0xff] }
  0xe2   : > { %1764 = vmatprep.subr.bf16.mxu0 %v1763_v21  ;;  %1786 = vmatpush3.bf16.msra.mxu1 %v1785_v40  ;;  %v761_v55 = vld [vmem:[#allocation8 + $0xb0] sm:$0xff]  ;;  %v762_v56 = vld [vmem:[#allocation8 + $0xb8] sm:$0xff]  ;;  %v637_v57 = vld [vmem:[#allocation6 + $0xe0] sm:$0xff]  ;;  %v1793_v59 = vpack.c.bf16 %v744_v52, %v743_v51  ;;  %v1773_v60 = vpack.c.bf16 %v620_v54, %v619_v49 }
  0xe3   : > { %1788 = vmatprep.subr.bf16.mxu1 %v1787_v42  ;;  %v638_v58 = vld [vmem:[#allocation6 + $0xe8] sm:$0xff]  ;;  %v1795_v61 = vpack.c.bf16 %v762_v56, %v761_v55  ;;  %v745_v62 = vld [vmem:[#allocation8 + $0x30] sm:$0xff]  ;;  %v746_v63 = vld [vmem:[#allocation8 + $0x38] sm:$0xff] }
  0xe4   : > { %v1775_v1 = vpack.c.bf16 %v638_v58, %v637_v57  ;;  %v621_v2 = vld [vmem:[#allocation6 + $0x60] sm:$0xff]  ;;  %v622_v3 = vld [vmem:[#allocation6 + $0x68] sm:$0xff]  ;;  %v639_v4 = vld [vmem:[#allocation6 + $0xf0] sm:$0xff]  ;;  %v1797_v6 = vpack.c.bf16 %v746_v63, %v745_v62 }
  0xe5   : > { %1766 = vmatpush3.bf16.msra.mxu0 %v1765_v32  ;;  %v640_v5 = vld [vmem:[#allocation6 + $0xf8] sm:$0xff]  ;;  %v1777_v7 = vpack.c.bf16 %v622_v3, %v621_v2  ;;  %v623_v9 = vld [vmem:[#allocation6 + $0x70] sm:$0xff]  ;;  %v863_v11 = vld [vmem:[#allocation9] sm:$0xff]  ;;  %v725_v3 = vlaneseq }
  0xe6   : > { %1768 = vmatprep.subr.bf16.mxu0 %v1767_v37  ;;  %1790 = vmatpush3.bf16.msra.mxu1 %v1789_v46  ;;  %v1779_v8 = vpack.c.bf16 %v640_v5, %v639_v4  ;;  %v624_v10 = vld [vmem:[#allocation6 + $0x78] sm:$0xff]  ;;  %v864_v12 = vld [vmem:[#allocation9 + $0x8] sm:$0xff]  ;;  %v865_v15 = vld [vmem:[#allocation9 + $0x10] sm:$0xff] }
  0xe7   : > { %1792 = vmatprep.subr.bf16.mxu1 %v1791_v50  ;;  %v1781_v13 = vpack.c.bf16 %v624_v10, %v623_v9  ;;  %v1815_v14 = vpack.c.bf16 %v864_v12, %v863_v11  ;;  %v866_v16 = vld [vmem:[#allocation9 + $0x18] sm:$0xff]  ;;  %v605_v17 = vld [vmem:[#allocation2 + $0x7] sm:$0xff]  ;;  %v867_v19 = vld [vmem:[#allocation9 + $0x20] sm:$0xff]  ;;  %v2729_v4 = vshrl.u32 %v725_v3, 7 }
  0xe8   : > { %v1819_v18 = vpack.c.bf16 %v866_v16, %v865_v15  ;;  %v868_v20 = vld [vmem:[#allocation9 + $0x28] sm:$0xff]  ;;  %v606_v21 = vld [vmem:[#allocation2 + $0xf] sm:$0xff]  ;;  %v763_v23 = vld [vmem:[#allocation8 + $0xc0] sm:$0xff] }
  0xe9   : > { %1770 = vmatpush3.bf16.msra.mxu0 %v1769_v48  ;;  %v1823_v22 = vpack.c.bf16 %v868_v20, %v867_v19  ;;  %v764_v24 = vld [vmem:[#allocation8 + $0xc8] sm:$0xff]  ;;  %v869_v25 = vld [vmem:[#allocation9 + $0x30] sm:$0xff]  ;;  %v870_v28 = vld [vmem:[#allocation9 + $0x38] sm:$0xff]  ;;  %v727_v5 = vsub.s32 0, %v2729_v4 }
  0xea   : > { %1772 = vmatprep.subr.bf16.mxu0 %v1771_v53  ;;  %1794 = vmatpush3.bf16.msra.mxu1 %v1793_v59  ;;  %v1799_v27 = vpack.c.bf16 %v764_v24, %v763_v23  ;;  %v747_v30 = vld [vmem:[#allocation8 + $0x40] sm:$0xff]  ;;  %v748_v31 = vld [vmem:[#allocation8 + $0x48] sm:$0xff]  ;;  %v1827_v32 = vpack.c.bf16 %v870_v28, %v869_v25  ;;  %v765_v34 = vld [vmem:[#allocation8 + $0xd0] sm:$0xff] }
  0xeb   : > { %1796 = vmatprep.subr.bf16.mxu1 %v1795_v61  ;;  %v1801_v33 = vpack.c.bf16 %v748_v31, %v747_v30  ;;  %v766_v35 = vld [vmem:[#allocation8 + $0xd8] sm:$0xff]  ;;  %v871_v36 = vld [vmem:[#allocation9 + $0x40] sm:$0xff]  ;;  %v749_v38 = vld [vmem:[#allocation8 + $0x50] sm:$0xff] }
  0xec   : > { %v1803_v37 = vpack.c.bf16 %v766_v35, %v765_v34  ;;  %v750_v39 = vld [vmem:[#allocation8 + $0x58] sm:$0xff]  ;;  %v767_v42 = vld [vmem:[#allocation8 + $0xe0] sm:$0xff]  ;;  %v768_v43 = vld [vmem:[#allocation8 + $0xe8] sm:$0xff] }
  0xed   : > { %1774 = vmatpush3.bf16.msra.mxu0 %v1773_v60  ;;  %v1805_v41 = vpack.c.bf16 %v750_v39, %v749_v38  ;;  %v873_v44 = vld [vmem:[#allocation9 + $0x50] sm:$0xff]  ;;  %v1807_v45 = vpack.c.bf16 %v768_v43, %v767_v42  ;;  %v874_v46 = vld [vmem:[#allocation9 + $0x58] sm:$0xff]  ;;  %v751_v47 = vld [vmem:[#allocation8 + $0x60] sm:$0xff] }
  0xee   : > { %1776 = vmatprep.subr.bf16.mxu0 %v1775_v1  ;;  %1798 = vmatpush3.bf16.msra.mxu1 %v1797_v6  ;;  %v752_v48 = vld [vmem:[#allocation8 + $0x68] sm:$0xff]  ;;  %v1835_v49 = vpack.c.bf16 %v874_v46, %v873_v44  ;;  %v769_v51 = vld [vmem:[#allocation8 + $0xf0] sm:$0xff]  ;;  %v770_v52 = vld [vmem:[#allocation8 + $0xf8] sm:$0xff] }
  0xef   : > { %1800 = vmatprep.subr.bf16.mxu1 %v1799_v27  ;;  %v1809_v50 = vpack.c.bf16 %v752_v48, %v751_v47  ;;  %v875_v53 = vld [vmem:[#allocation9 + $0x60] sm:$0xff]  ;;  %v1811_v54 = vpack.c.bf16 %v770_v52, %v769_v51  ;;  %v876_v55 = vld [vmem:[#allocation9 + $0x68] sm:$0xff]  ;;  %v753_v56 = vld [vmem:[#allocation8 + $0x70] sm:$0xff] }
  0xf0   : > { %v754_v57 = vld [vmem:[#allocation8 + $0x78] sm:$0xff]  ;;  %v1839_v58 = vpack.c.bf16 %v876_v55, %v875_v53  ;;  %v877_v60 = vld [vmem:[#allocation9 + $0x70] sm:$0xff]  ;;  %v996_v63 = vld [vmem:[#allocation11 + $0x80] sm:$0xff] }
  0xf1   : > { %1778 = vmatpush3.bf16.msra.mxu0 %v1777_v7  ;;  %v1813_v59 = vpack.c.bf16 %v754_v57, %v753_v56  ;;  %v878_v61 = vld [vmem:[#allocation9 + $0x78] sm:$0xff]  ;;  %v997_v1 = vld [vmem:[#allocation11 + $0x88] sm:$0xff]  ;;  %v980_v19 = vld [vmem:[#allocation11] sm:$0xff] }
  0xf2   : > { %1780 = vmatprep.subr.bf16.mxu0 %v1779_v8  ;;  %1802 = vmatpush3.bf16.msra.mxu1 %v1801_v33  ;;  %v1843_v62 = vpack.c.bf16 %v878_v61, %v877_v60  ;;  %v1847_v2 = vpack.c.bf16 %v997_v1, %v996_v63  ;;  %v2735_v6 = vld [vmem:[%s2841_s5] sm:$0x7]  ;;  %v999_v23 = vld [vmem:[#allocation11 + $0x98] sm:$0xff]  ;;  %v982_v27 = vld [vmem:[#allocation11 + $0x10] sm:$0xff] }
  0xf3   : > { %1804 = vmatprep.subr.bf16.mxu1 %v1803_v37  ;;  %v1485_v8 = vld [vmem:[%s2838_s2] ss:$0 sm:$0xff]  ;;  %v983_v28 = vld [vmem:[#allocation11 + $0x18] sm:$0xff]  ;;  %v1000_v31 = vld [vmem:[#allocation11 + $0xa0] sm:$0xff] }
  0xf4   : > { %v981_v20 = vld [vmem:[#allocation11 + $0x8] sm:$0xff]  ;;  %v1853_v33 = vpack.c.bf16 %v983_v28, %v982_v27  ;;  %v1002_v38 = vld [vmem:[#allocation11 + $0xb0] sm:$0xff]  ;;  %v1003_v39 = vld [vmem:[#allocation11 + $0xb8] sm:$0xff] }
  0xf5   : > { %1782 = vmatpush3.bf16.msra.mxu0 %v1781_v13  ;;  %v1849_v24 = vpack.c.bf16 %v981_v20, %v980_v19  ;;  %v985_v37 = vld [vmem:[#allocation11 + $0x28] sm:$0xff]  ;;  %v987_v42 = vld [vmem:[#allocation11 + $0x38] sm:$0xff]  ;;  %v1004_v44 = vld [vmem:[#allocation11 + $0xc0] sm:$0xff] }
  0xf6   : > { %1816 = vmatprep.subr.bf16.mxu0 %v1815_v14  ;;  %1806 = vmatpush3.bf16.msra.mxu1 %v1805_v41  ;;  %v986_v41 = vld [vmem:[#allocation11 + $0x30] sm:$0xff]  ;;  %v988_v47 = vld [vmem:[#allocation11 + $0x40] sm:$0xff]  ;;  %v989_v48 = vld [vmem:[#allocation11 + $0x48] sm:$0xff] }
  0xf7   : > { %1808 = vmatprep.subr.bf16.mxu1 %v1807_v45  ;;  %v1861_v43 = vpack.c.bf16 %v987_v42, %v986_v41  ;;  %v1005_v45 = vld [vmem:[#allocation11 + $0xc8] sm:$0xff]  ;;  %v1006_v52 = vld [vmem:[#allocation11 + $0xd0] sm:$0xff]  ;;  %v1007_v53 = vld [vmem:[#allocation11 + $0xd8] sm:$0xff]  ;;  %v967_v41 = vsub.s32 2, %v2729_v4 }
  0xf8   : > { %713 = vmatmul.mubr.f32.vlgmr.msra.gmra.mrb[0].mxu0 %v605_v17  ;;  %v1863_v46 = vpack.c.bf16 %v1005_v45, %v1004_v44  ;;  %v990_v55 = vld [vmem:[#allocation11 + $0x50] sm:$0xff]  ;;  %v991_v56 = vld [vmem:[#allocation11 + $0x58] sm:$0xff]  ;;  %v992_v61 = vld [vmem:[#allocation11 + $0x60] sm:$0xff] }
  0xf9   : > { %717 = vmatprep.mubr.f32.mxu0 %v2723_v29  ;;  %1818 = vmatpush3.bf16.msra.mxu0 %v1815_v14  ;;  %v1869_v57 = vpack.c.bf16 %v991_v56, %v990_v55  ;;  %v1010_v1 = vld [vmem:[#allocation11 + $0xf0] sm:$0xff]  ;;  %v1113_v19 = vld [vmem:[#allocation12 + $0x18] sm:$0xff]  ;;  %v1130_v20 = vld [vmem:[#allocation12 + $0xa0] sm:$0xff] }
  0xfa   : > { %1820 = vmatprep.subr.bf16.mxu0 %v1819_v18  ;;  %1810 = vmatpush3.bf16.msra.mxu1 %v1809_v50  ;;  %v1865_v50 = vpack.c.bf16 %v989_v48, %v988_v47  ;;  %v1132_v27 = vld [vmem:[#allocation12 + $0xb0] sm:$0xff]  ;;  %v1133_v28 = vld [vmem:[#allocation12 + $0xb8] sm:$0xff]  ;;  %v968_v48 = vrot.slane %v2735_v6, %v967_v41 }
  0xfb   : > { %1812 = vmatprep.subr.bf16.mxu1 %v1811_v54  ;;  %v1867_v54 = vpack.c.bf16 %v1007_v53, %v1006_v52 }
  0xfc   : > { %718 = vmatmul.mubr.f32.gmra.mrb[2].mxu0 %v606_v21 }
  0xfd   : > { %1822 = vmatpush3.bf16.msra.mxu0 %v1819_v18  ;;  %1713 = vmatprep.mubr.f32.mxu0 %v2718_v26  ;;  %v872_v26 = vld [vmem:[#allocation9 + $0x48] sm:$0xff] }
  0xfe   : > { %1824 = vmatprep.subr.bf16.mxu0 %v1823_v22  ;;  %v1831_v40 = vpack.c.bf16 %v872_v26, %v871_v36  ;;  %1814 = vmatpush3.bf16.msra.mxu1 %v1813_v59  ;;  %v984_v36 = vld [vmem:[#allocation11 + $0x20] sm:$0xff]  ;;  %v1009_v59 = vld [vmem:[#allocation11 + $0xe8] sm:$0xff] }
  0xff   : > { %1848 = vmatprep.subr.bf16.mxu1 %v1847_v2  ;;  %v1857_v26 = vpack.c.bf16 %v985_v37, %v984_v36  ;;  %v1011_v2 = vld [vmem:[#allocation11 + $0xf8] sm:$0xff]  ;;  %v1486_v37 = vld [vmem:[%s2883_s1] ss:$0 sm:$0xff] }
 0x100   : > { %v1875_v3 = vpack.c.bf16 %v1011_v2, %v1010_v1  ;;  %v1118_v1 = vld [vmem:[#allocation12 + $0x40] sm:$0xff]  ;;  %v1119_v2 = vld [vmem:[#allocation12 + $0x48] sm:$0xff] }
 0x101   : > { %1826 = vmatpush3.bf16.msra.mxu0 %v1823_v22  ;;  %v998_v22 = vld [vmem:[#allocation11 + $0x90] sm:$0xff] }
 0x102   : > { %1828 = vmatprep.subr.bf16.mxu0 %v1827_v32  ;;  %v1851_v25 = vpack.c.bf16 %v999_v23, %v998_v22 }
 0x105   : > { %1830 = vmatpush3.bf16.msra.mxu0 %v1827_v32  ;;  %v1001_v32 = vld [vmem:[#allocation11 + $0xa8] sm:$0xff] }
 0x106   : > { %1832 = vmatprep.subr.bf16.mxu0 %v1831_v40  ;;  %v1855_v34 = vpack.c.bf16 %v1001_v32, %v1000_v31  ;;  %v1891_v31 = vpack.c.bf16 %v1133_v28, %v1132_v27  ;;  %v1116_v32 = vld [vmem:[#allocation12 + $0x30] sm:$0xff]  ;;  %v2335_v28 = vmov 0.0|0.0  }
 0x107   : > { %v1240_v27 = vld [vmem:[#allocation14 + $0x10] sm:$0xff] }
 0x109   : > { %1834 = vmatpush3.bf16.msra.mxu0 %v1831_v40  ;;  %v1859_v40 = vpack.c.bf16 %v1003_v39, %v1002_v38 }
 0x10a   : > { %1836 = vmatprep.subr.bf16.mxu0 %v1835_v49 }
 0x10d   : > { %1838 = vmatpush3.bf16.msra.mxu0 %v1835_v49 }
 0x10e   : > { %1840 = vmatprep.subr.bf16.mxu0 %v1839_v58 }
 0x111   : > { %1842 = vmatpush3.bf16.msra.mxu0 %v1839_v58  ;;  %v1008_v58 = vld [vmem:[#allocation11 + $0xe0] sm:$0xff] }
 0x112   : > { %1844 = vmatprep.subr.bf16.mxu0 %v1843_v62  ;;  %v1871_v60 = vpack.c.bf16 %v1009_v59, %v1008_v58 }
 0x115   : > { %1846 = vmatpush3.bf16.msra.mxu0 %v1843_v62  ;;  %v993_v62 = vld [vmem:[#allocation11 + $0x68] sm:$0xff] }
 0x116   : > { %v1873_v63 = vpack.c.bf16 %v993_v62, %v992_v61  ;;  %v1135_v62 = vld [vmem:[#allocation12 + $0xc8] sm:$0xff] }
 0x118   : > { %1714 = vmatmul.mubr.f32.vlgmr.msra.gmra.mrb[4].mxu0 %v2723_v29  ;;  %v728_v29 = vrot.slane %v2735_v6, %v727_v5 }
 0x1cb   : > { %v1526_v7 = vpop.f32.mrb[0].mxu0 }
 0x1cc   : > { %v1527_v9 = vpop.f32.mrb[1].mxu0 }
 0x1cd   : > { %v1528_v10 = vadd.f32 %v1527_v9, %v1526_v7  ;;  %v994_v7 = vld [vmem:[#allocation11 + $0x70] sm:$0xff] }
 0x1cf   : > { %v715_v11 = vadd.f32 %v1528_v10, %v1485_v8  ;;  %v1529_v12 = vpop.f32.mrb[2].mxu0  ;;  %v1126_v10 = vld [vmem:[#allocation12 + $0x80] sm:$0xff] }
 0x1d0   : > { %v1530_v13 = vpop.f32.mrb[3].mxu0 }
 0x1d1   : > { %vm723_vm0 = vcmp.ge.f32.partialorder %v715_v11, 0.0  ;;  %v729_v14 = vmul.f32 %v728_v29, %v715_v11  ;;  %v1531_v15 = vadd.f32 %v1530_v13, %v1529_v12  ;;  %v1111_v13 = vld [vmem:[#allocation12 + $0x8] sm:$0xff] }
 0x1d3   : > { %v731_v16 = vsel %vm723_vm0, %v715_v11, %v729_v14  ;;  %v720_v17 = vadd.f32 %v1531_v15, %v1485_v8  ;;  %v995_v8 = vld [vmem:[#allocation11 + $0x78] sm:$0xff]  ;;  %v1110_v11 = vld [vmem:[#allocation12] sm:$0xff]  ;;  %v1128_v14 = vld [vmem:[#allocation12 + $0x90] sm:$0xff] }
 0x1d4   : > { %733 = vst [vmem:[#allocation2 + $0x8] sm:$0xff] %v731_v16  ;;  %842 = vmatprep.mubr.f32.mxu1 %v731_v16  ;;  %v1877_v9 = vpack.c.bf16 %v995_v8, %v994_v7  ;;  %v1129_v15 = vld [vmem:[#allocation12 + $0x98] sm:$0xff]  ;;  %v1881_v16 = vpack.c.bf16 %v1111_v13, %v1110_v11  ;;  %v1136_v7 = vld [vmem:[#allocation12 + $0xd0] sm:$0xff]  ;;  %v1139_v13 = vld [vmem:[#allocation12 + $0xe8] sm:$0xff] }
 0x1d5   : > { %vm724_vm1 = vcmp.ge.f32.partialorder %v720_v17, 0.0  ;;  %v730_v18 = vmul.f32 %v728_v29, %v720_v17  ;;  %v1127_v29 = vld [vmem:[#allocation12 + $0x88] sm:$0xff]  ;;  %v1137_v8 = vld [vmem:[#allocation12 + $0xd8] sm:$0xff] }
 0x1d6   : > { %v1879_v12 = vpack.c.bf16 %v1127_v29, %v1126_v10  ;;  %v1120_v10 = vld [vmem:[#allocation12 + $0x50] sm:$0xff]  ;;  %v1121_v29 = vld [vmem:[#allocation12 + $0x58] sm:$0xff] }
 0x1d7   : > { %v732_v21 = vsel %vm724_vm1, %v720_v17, %v730_v18  ;;  %v1883_v17 = vpack.c.bf16 %v1129_v15, %v1128_v14  ;;  %v1112_v18 = vld [vmem:[#allocation12 + $0x10] sm:$0xff]  ;;  %v1901_v11 = vpack.c.bf16 %v1121_v29, %v1120_v10  ;;  %v1122_v15 = vld [vmem:[#allocation12 + $0x60] sm:$0xff]  ;;  %v1489_v29 = vld [vmem:[%s2887_s30] ss:$0 sm:$0xff] }
 0x1d8   : > { %734 = vst [vmem:[#allocation2 + $0x10] sm:$0xff] %v732_v21  ;;  %1880 = vmatprep.subr.bf16.mxu0 %v1879_v12  ;;  %v1885_v22 = vpack.c.bf16 %v1113_v19, %v1112_v18  ;;  %v1138_v12 = vld [vmem:[#allocation12 + $0xe0] sm:$0xff]  ;;  %v1140_v18 = vld [vmem:[#allocation12 + $0xf0] sm:$0xff]  ;;  %v1141_v19 = vld [vmem:[#allocation12 + $0xf8] sm:$0xff] }
 0x1d9   : > { %1882 = vmatpush3.bf16.msra.mxu0 %v1881_v16  ;;  %v1903_v14 = vpack.c.bf16 %v1139_v13, %v1138_v12  ;;  %v1123_v16 = vld [vmem:[#allocation12 + $0x68] sm:$0xff] }
 0x1da   : > { %1884 = vmatprep.subr.bf16.mxu0 %v1883_v17  ;;  %v1905_v17 = vpack.c.bf16 %v1123_v16, %v1122_v15 }
 0x1db   : > { %v735_v30 = vld [vmem:[#allocation2 + $0x7] sm:$0xff] }
 0x1dc   : > { %843 = vmatmul.mubr.f32.vlgmr.msra.gmra.mrb[0].mxu1 %v735_v30 }
 0x1dd   : > { %847 = vmatprep.mubr.f32.mxu1 %v732_v21  ;;  %1850 = vmatpush3.bf16.msra.mxu1 %v1849_v24  ;;  %v1131_v21 = vld [vmem:[#allocation12 + $0xa8] sm:$0xff]  ;;  %v1114_v24 = vld [vmem:[#allocation12 + $0x20] sm:$0xff] }
 0x1de   : > { %1852 = vmatprep.subr.bf16.mxu1 %v1851_v25  ;;  %v1887_v23 = vpack.c.bf16 %v1131_v21, %v1130_v20  ;;  %v1115_v25 = vld [vmem:[#allocation12 + $0x28] sm:$0xff]  ;;  %1886 = vmatpush3.bf16.msra.mxu0 %v1885_v22  ;;  %v1907_v20 = vpack.c.bf16 %v1141_v19, %v1140_v18  ;;  %v1124_v21 = vld [vmem:[#allocation12 + $0x70] sm:$0xff]  ;;  %v1125_v22 = vld [vmem:[#allocation12 + $0x78] sm:$0xff] }
 0x1df   : > { %v736_v35 = vld [vmem:[#allocation2 + $0xf] sm:$0xff]  ;;  %v1889_v30 = vpack.c.bf16 %v1115_v25, %v1114_v24  ;;  %v1238_v24 = vld [vmem:[#allocation14] sm:$0xff]  ;;  %v1239_v25 = vld [vmem:[#allocation14 + $0x8] sm:$0xff] }
 0x1e0   : > { %848 = vmatmul.mubr.f32.gmra.mrb[2].mxu1 %v736_v35  ;;  %1888 = vmatprep.subr.bf16.mxu0 %v1887_v23  ;;  %v857_v35 = vsub.s32 1, %v2729_v4  ;;  %v1909_v23 = vpack.c.bf16 %v1125_v22, %v1124_v21 }
 0x1e1   : > { %1854 = vmatpush3.bf16.msra.mxu1 %v1853_v33  ;;  %v1117_v33 = vld [vmem:[#allocation12 + $0x38] sm:$0xff] }
 0x1e2   : > { %1856 = vmatprep.subr.bf16.mxu1 %v1855_v34  ;;  %1890 = vmatpush3.bf16.msra.mxu0 %v1889_v30  ;;  %v1893_v34 = vpack.c.bf16 %v1117_v33, %v1116_v32  ;;  %v858_v39 = vrot.slane %v2735_v6, %v857_v35  ;;  %v1912_v30 = vpack.c.bf16 %v1239_v25, %v1238_v24  ;;  %v1242_v33 = vld [vmem:[#allocation14 + $0x20] sm:$0xff] }
 0x1e3   : > { %1892 = vmatprep.subr.bf16.mxu0 %v1891_v31  ;;  %v1241_v31 = vld [vmem:[#allocation14 + $0x18] sm:$0xff] }
 0x1e4   : > { %v1915_v32 = vpack.c.bf16 %v1241_v31, %v1240_v27 }
 0x1e5   : > { %1858 = vmatpush3.bf16.msra.mxu1 %v1857_v26 }
 0x1e6   : > { %1860 = vmatprep.subr.bf16.mxu1 %v1859_v40  ;;  %1894 = vmatpush3.bf16.msra.mxu0 %v1893_v34  ;;  %v1487_v40 = vld [vmem:[%s2884_s16] ss:$0 sm:$0xff]  ;;  %s1490_s16 = sshll.u32 %s2439_s24, 4  ;;  %s2337_s24 = smov [#allocation15]  }
 0x1e7   : > { %v1243_v34 = vld [vmem:[#allocation14 + $0x28] sm:$0xff]  ;;  %s2249_s30 = sshll.u32 %s2337_s24, 4  ;;  %s2250_s30 = int_to_ptr.vmem [resolvable:$false] %s2249_s30 }
 0x1e8   : > { %s2251_s1 = scalar_lea.vmem %s2250_s30, 32  ;;  %p2252_p13 = scmp.lt.s32.totalorder %s2794_s17, %s2250_s30 }
 0x1e9   : > { %1862 = vmatpush3.bf16.msra.mxu1 %v1861_v43  ;;  %p2253_p0 = scmp.lt.s32.totalorder %s2251_s1, %s2245_s9 }
 0x1ea   : > { %1864 = vmatprep.subr.bf16.mxu1 %v1863_v46 }
 0x1eb   : > { %v2743_v49 = vpop.f32.mrb[4].mxu0  ;;  %p2254_p2 = por %p2253_p0, %p2252_p13 }
 0x1ec   : > { %v2745_v51 = vpop.f32.mrb[5].mxu0  ;;  %v958_v55 = vadd.f32 %v2743_v49, %v1487_v40  ;;  %v1134_v49 = vld [vmem:[#allocation12 + $0xc0] sm:$0xff] }
 0x1ed   : > { %1866 = vmatpush3.bf16.msra.mxu1 %v1865_v50  ;;  %v953_v45 = vadd.f32 %v1487_v40, %v2745_v51  ;;  %p2255_p8 = pnand %p2254_p2, %p2248_p1 }
 0x1ee   : > { %1868 = vmatprep.subr.bf16.mxu1 %v1867_v54 }
 0x1f1   : > { %1870 = vmatpush3.bf16.msra.mxu1 %v1869_v57 }
 0x1f2   : > { %1872 = vmatprep.subr.bf16.mxu1 %v1871_v60 }
 0x1f5   : > { %1874 = vmatpush3.bf16.msra.mxu1 %v1873_v63  ;;  %v1895_v63 = vpack.c.bf16 %v1135_v62, %v1134_v49  ;;  %v1250_v62 = vld [vmem:[#allocation14 + $0x60] sm:$0xff] }
 0x1f6   : > { %1876 = vmatprep.subr.bf16.mxu1 %v1875_v3  ;;  %v1897_v3 = vpack.c.bf16 %v1119_v2, %v1118_v1  ;;  %v1252_v2 = vld [vmem:[#allocation14 + $0x70] sm:$0xff] }
 0x1f7   : > { %1896 = vmatprep.subr.bf16.mxu0 %v1895_v63  ;;  %v1251_v63 = vld [vmem:[#allocation14 + $0x68] sm:$0xff] }
 0x1f8   : > { %1898 = vmatpush3.bf16.msra.mxu0 %v1897_v3  ;;  %v1930_v1 = vpack.c.bf16 %v1251_v63, %v1250_v62  ;;  %v1253_v3 = vld [vmem:[#allocation14 + $0x78] sm:$0xff] }
 0x1f9   : > { %1878 = vmatpush3.bf16.msra.mxu1 %v1877_v9  ;;  %v1899_v9 = vpack.c.bf16 %v1137_v8, %v1136_v7  ;;  %v1933_v7 = vpack.c.bf16 %v1253_v3, %v1252_v2 }
 0x1fa   : > { %1911 = vmatprep.subr.bf16.mxu1 %v2335_v28 }
 0x1fb   : > { %1900 = vmatprep.subr.bf16.mxu0 %v1899_v9 }
 0x1fc   : > { %1902 = vmatpush3.bf16.msra.mxu0 %v1901_v11 }
 0x1fd   : > { %1904 = vmatprep.subr.bf16.mxu0 %v1903_v14 }
 0x200   : > { %1906 = vmatpush3.bf16.msra.mxu0 %v1905_v17 }
 0x201   : > { %1908 = vmatprep.subr.bf16.mxu0 %v1907_v20 }
 0x204   : > { %1910 = vmatpush3.bf16.msra.mxu0 %v1909_v23 }
 0x2af   : > { %v1564_v36 = vpop.f32.mrb[0].mxu1 }
 0x2b0   : > { %v1565_v26 = vpop.f32.mrb[1].mxu1 }
 0x2b1   : > { %v1566_v38 = vadd.f32 %v1565_v26, %v1564_v36  ;;  %v1918_v36 = vpack.c.bf16 %v1243_v34, %v1242_v33 }
 0x2b3   : > { %v845_v42 = vadd.f32 %v1566_v38, %v1486_v37  ;;  %v1567_v43 = vpop.f32.mrb[2].mxu1  ;;  %v1488_v38 = vld [vmem:[%s2886_s11] ss:$0 sm:$0xff]  ;;  %s2792_s11 = scalar_lea.hbm %s2889_s15, %s1490_s16 }
 0x2b4   : > { %v1568_v44 = vpop.f32.mrb[3].mxu1 }
 0x2b5   : > { %v859_v46 = vmul.f32 %v858_v39, %v845_v42  ;;  %v1569_v47 = vadd.f32 %v1568_v44, %v1567_v43  ;;  %vm853_vm2 = vcmp.ge.f32.partialorder %v845_v42, 0.0 }
 0x2b7   : > { %v850_v50 = vadd.f32 %v1569_v47, %v1486_v37  ;;  %v861_v52 = vsel %vm853_vm2, %v845_v42, %v859_v46  ;;  %v973_v37 = vld [vmem:[%s2885_s14] sm:$0x7] }
 0x2b8   : > { %v961_v53 = vadd.f32 %v953_v45, %v861_v52  ;;  %v1099_v42 = vrot.slane %v973_v37, %v727_v5  ;;  %v1244_v5 = vld [vmem:[#allocation14 + $0x30] sm:$0xff]  ;;  %v1227_v13 = vrot.slane %v973_v37, %v857_v35  ;;  %v1254_v35 = vld [vmem:[%s2888_s23] sm:$0x1] }
 0x2b9   : > { %vm854_vm3 = vcmp.ge.f32.partialorder %v850_v50, 0.0  ;;  %v860_v54 = vmul.f32 %v858_v39, %v850_v50 }
 0x2ba   : > { %vm963_vm4 = vcmp.ge.f32.partialorder %v961_v53, 0.0  ;;  %v969_v56 = vmul.f32 %v968_v48, %v961_v53 }
 0x2bb   : > { %v862_v57 = vsel %vm854_vm3, %v850_v50, %v860_v54 }
 0x2bc   : > { %v962_v58 = vadd.f32 %v958_v55, %v862_v57  ;;  %v971_v59 = vsel %vm963_vm4, %v961_v53, %v969_v56  ;;  %v1245_v56 = vld [vmem:[#allocation14 + $0x38] sm:$0xff] }
 0x2bd   : > { %974 = vst [vmem:[#allocation2 + $0x8] sm:$0xff] %v971_v59  ;;  %1083 = vmatprep.mubr.f32.mxu1 %v971_v59  ;;  %v1921_v57 = vpack.c.bf16 %v1245_v56, %v1244_v5  ;;  %v1247_v59 = vld [vmem:[#allocation14 + $0x48] sm:$0xff] }
 0x2be   : > { %vm964_vm5 = vcmp.ge.f32.partialorder %v962_v58, 0.0  ;;  %v970_v51 = vmul.f32 %v968_v48, %v962_v58 }
 0x2c0   : > { %v2763_v60 = vsel %vm964_vm5, %v962_v58, %v970_v51  ;;  %v1246_v58 = vld [vmem:[#allocation14 + $0x40] sm:$0xff] }
 0x2c1   : > { %975 = vst [vmem:[#allocation2 + $0x10] sm:$0xff] %v2763_v60  ;;  %v1924_v51 = vpack.c.bf16 %v1247_v59, %v1246_v58 }
 0x2c4   : > { %v976_v6 = vld [vmem:[#allocation2 + $0x6] sm:$0xff] }
 0x2c5   : > { %1084 = vmatmul.mubr.f32.vlgmr.msra.gmra.mrb[4].mxu1 %v976_v6  ;;  %v1248_v6 = vld [vmem:[#allocation14 + $0x50] sm:$0xff] }
 0x2c6   : > { %1088 = vmatprep.mubr.f32.mxu1 %v2763_v60  ;;  %1913 = vmatpush3.bf16.msra.mxu1 %v1912_v30 }
 0x2c7   : > { %1914 = vmatprep.subr.bf16.mxu1 %v2335_v28 }
 0x2c8   : > { %v977_v61 = vld [vmem:[#allocation2 + $0xe] sm:$0xff] }
 0x2c9   : > { %1089 = vmatmul.mubr.f32.gmra.mrb[6].mxu1 %v977_v61  ;;  %v1249_v61 = vld [vmem:[#allocation14 + $0x58] sm:$0xff] }
 0x2ca   : > { %1916 = vmatpush3.bf16.msra.mxu1 %v1915_v32  ;;  %v1927_v49 = vpack.c.bf16 %v1249_v61, %v1248_v6  ;;  %1748 = vmatprep.mubr.msk.f32.mxu1 %vm2336_vm8, %v2334_v0  ;;  %v1235_v0 = vrot.slane %v973_v37, %v967_v41 }
 0x2cb   : > { %1917 = vmatprep.subr.bf16.mxu1 %v2335_v28 }
 0x2ce   : > { %1919 = vmatpush3.bf16.msra.mxu1 %v1918_v36 }
 0x2cf   : > { %1920 = vmatprep.subr.bf16.mxu1 %v2335_v28 }
 0x2d2   : > { %1922 = vmatpush3.bf16.msra.mxu1 %v1921_v57 }
 0x2d3   : > { %1923 = vmatprep.subr.bf16.mxu1 %v2335_v28 }
 0x2d6   : > { %1925 = vmatpush3.bf16.msra.mxu1 %v1924_v51 }
 0x2d7   : > { %1926 = vmatprep.subr.bf16.mxu1 %v2335_v28 }
 0x2da   : > { %1928 = vmatpush3.bf16.msra.mxu1 %v1927_v49 }
 0x2db   : > { %1929 = vmatprep.subr.bf16.mxu1 %v2335_v28 }
 0x2de   : > { %1931 = vmatpush3.bf16.msra.mxu1 %v1930_v1 }
 0x2df   : > { %1932 = vmatprep.subr.bf16.mxu1 %v2335_v28 }
 0x2e2   : > { %1934 = vmatpush3.bf16.msra.mxu1 %v1933_v7 }
 0x398   : > { %v1620_v26 = vpop.f32.mrb[4].mxu1 }
 0x399   : > { %v1621_v39 = vpop.f32.mrb[5].mxu1 }
 0x39a   : > { %v1622_v40 = vadd.f32 %v1621_v39, %v1620_v26 }
 0x39c   : > { %v1086_v43 = vadd.f32 %v1622_v40, %v1488_v38  ;;  %v1623_v44 = vpop.f32.mrb[6].mxu1 }
 0x39d   : > { %v1624_v45 = vpop.f32.mrb[7].mxu1 }
 0x39e   : > { %vm1094_vm6 = vcmp.ge.f32.partialorder %v1086_v43, 0.0  ;;  %v1100_v46 = vmul.f32 %v1099_v42, %v1086_v43  ;;  %v1625_v47 = vadd.f32 %v1624_v45, %v1623_v44 }
 0x3a0   : > { %v1102_v48 = vsel %vm1094_vm6, %v1086_v43, %v1100_v46  ;;  %v1091_v50 = vadd.f32 %v1625_v47, %v1488_v38 }
 0x3a1   : > { %1104 = vst [vmem:[#allocation2 + $0x8] sm:$0xff] %v1102_v48  ;;  %1213 = vmatprep.mubr.f32.mxu0 %v1102_v48 }
 0x3a2   : > { %vm1095_vm7 = vcmp.ge.f32.partialorder %v1091_v50, 0.0  ;;  %v1101_v52 = vmul.f32 %v1099_v42, %v1091_v50 }
 0x3a4   : > { %v1103_v53 = vsel %vm1095_vm7, %v1091_v50, %v1101_v52 }
 0x3a5   : > { %1105 = vst [vmem:[#allocation2 + $0x10] sm:$0xff] %v1103_v53 }
 0x3a8   : > { %v1106_v54 = vld [vmem:[#allocation2 + $0x6] sm:$0xff] }
 0x3a9   : > { %1214 = vmatmul.mubr.f32.vlgmr.msra.gmra.mrb[6].mxu0 %v1106_v54 }
 0x3aa   : > { %1217 = vmatprep.mubr.f32.mxu0 %v1103_v53 }
 0x3ac   : > { %v1107_v55 = vld [vmem:[#allocation2 + $0xe] sm:$0xff] }
 0x3ad   : > { %1218 = vmatmul.mubr.f32.gmra.mrb[8].mxu0 %v1107_v55 }
 0x47c   : > { %v1658_v8 = vpop.f32.mrb[6].mxu0 }
 0x47d   : > { %v1659_v9 = vpop.f32.mrb[7].mxu0 }
 0x480   : > { %v1661_v10 = vpop.f32.mrb[8].mxu0 }
 0x481   : > { %v1662_v11 = vpop.f32.mrb[9].mxu0 }
 0x482   : > { %v1663_v12 = vadd.f32 %v1662_v11, %v1661_v10 }
 0x484   : > { %v1220_v14 = vadd.f32 %v1663_v12, %v1489_v29 }
 0x486   : > { %vm1223_vm9 = vcmp.ge.f32.partialorder %v1220_v14, 0.0  ;;  %v1228_v15 = vmul.f32 %v1227_v13, %v1220_v14 }
 0x488   : > { %v1229_v16 = vsel %vm1223_vm9, %v1220_v14, %v1228_v15 }
 0x489   : > { %v1230_v17 = vadd.f32 %v1229_v16, %v2763_v60 }
 0x48b   : > { %vm1231_vm10 = vcmp.ge.f32.partialorder %v1230_v17, 0.0  ;;  %v1236_v18 = vmul.f32 %v1235_v0, %v1230_v17 }
 0x48d   : > { %v1237_v19 = vsel %vm1231_vm10, %v1230_v17, %v1236_v18 }
 0x48e   : > { %v1256_v20 = vrot.slane %v1237_v19, 7 }
 0x490   : > { %1749 = vmatmul.mubr.f32.vlgmr.msra.gmra.mrb[8].mxu1 %v1256_v20 }
 0x563   : > { %v1324_v21 = vpop.f32.mrb[8].mxu1 }
 0x564   : > { %v1325_v4 = vadd.f32 %v1324_v21, %v1254_v35  ;;  %v1750_v41 = vpop.f32.mrb[9].mxu1 }
 0x566   : > { %1328 = vst [vmem:[%s598_s28] sm:$0x1] %v1325_v4 }
 0x567   : > { %2258 = shalt.err (!%p2255_p8)
}
 0x568   : > { %s2259_s12 = scalar_lea.hbm %s2792_s11, 16  ;;  %s2263_s16 = scalar_lea.hbm %s2889_s15, 32 }
 0x569   : > { %p2260_p4 = scmp.ne.s32.totalorder %s2792_s11, %s2259_s12  ;;  %p2264_p3 = scmp.lt.u32.totalorder %s2792_s11, %s2889_s15 }
 0x56a   : > { %p2265_p5 = scmp.lt.u32.totalorder %s2263_s16, %s2259_s12  ;;  %p2267_p6 = scmp.lt.u32.totalorder %s2259_s12, %s2792_s11 }
 0x56b   : > { %p2261_p10 = pnand %p2260_p4, %p2890_p9 }
 0x56c   : > { %p2266_p7 = por %p2265_p5, %p2264_p3 }
 0x56d   : > { %p2262_p11 = pneg %p2261_p10 }
 0x56e   : > { %p2268_p12 = por %p2267_p6, %p2266_p7 }
 0x570   : > { %p2269_p1 = pnand %p2268_p12, %p2262_p11 }
 0x572   : > { %2272 = shalt.err (!%p2269_p1)
}
 0x573   : > { %1961 = dma.vmem_to_hbm [thread:$0]  (%p2890_p9), %s2794_s17, 16, %s2792_s11, %s1330_s4  }
 0x574 PF: > { %s1354_s25 = sand.u32 1, %s2311_s18   ;;  %p2891_p13 = scmp.ne.s32.totalorder %s2873_s29, 0 }
 0x575   : > { %p2892_p0 = scmp.ge.s32.totalorder %s2323_s21, 2  ;;  %s1355_s9 = scalar_lea.sflag [#allocation5], %s1354_s25 }
 0x577   : > { %p1987_p2 = pnand %p2892_p0, %p2891_p13 }
 0x579   : > { %2306 = dma.done.wait (!%p1987_p2), %s1355_s9, 16  }
 0x57a   : > { %2308 = vsyncadd (!%p1987_p2), %s1355_s9, 4294967280  ;;  %p31_p8 = scmp.ge.s32.totalorder %s2612_s26, 4   ;;  %s2893_s18 = smov %s2315_s19 }
 0x57b   : > { %s2894_s19 = smov %s2319_s20  ;;  %s2895_s20 = smov %s2623_s7 }
 0x57c   : > { %s2896_s21 = smov %s2612_s26  ;;  %33 = sbr.rel (!%p31_p8) target bundleno = 17 (0x11), region = 149 }
 0x583   :  { %1359 = vsyncpa [#allocation4], 1 }
 0x584   :  { %1361 = vsyncpa [#allocation4 + $0x1], 1 }
 0x585   :  { %1362 = vsyncpa [#allocation7], 1 }
 0x586   :  { %1363 = vsyncpa [#allocation10], 1 }
 0x587   :  { %1364 = vsyncpa [#allocation13], 1 }
 0x588   :  { %1365 = vsyncpa [#allocation5], 1 }
 0x589   :  { %1367 = vsyncpa [#allocation5 + $0x1], 1 }

</bundles_post_ra>
